<compile_context>
chip_gen: v7x
topology: tpu7x:2x2x1
jax: 0.10.0
libtpu: 0.0.40
codegen_flags: <defaults>
</compile_context>

<pallas_src>
import functools

import jax
import jax.numpy as jnp
from jax.experimental import pallas as pl
from jax.experimental.pallas import tpu as pltpu


def _round_up(x, m):
    return ((x + m - 1) // m) * m


def _conv1_vpu(x, w1_ref, b1_ref):
    """conv1 on the VPU: (ndf, C) x (C, TP) with tiny C, as broadcast mul-adds."""
    w1 = w1_ref[...]                                        # (ndf, C) f32
    h1 = b1_ref[...] + w1[:, 0:1] * x[0:1, :]               # (ndf, TP)
    for c in range(1, w1.shape[1]):
        h1 = h1 + w1[:, c:c + 1] * x[c:c + 1, :]
    return h1


# -----------------------------------------------------------------------------
# Pass 1: per-image, per-channel sum / sum-of-squares of h2 over valid pixels.
# Grid: (batch [parallel], pixel-tile [arbitrary]).
# -----------------------------------------------------------------------------
def _stats_kernel(x_ref, w1_ref, b1_ref, w2b_ref, sum_ref, ssq_ref, *,
                  tile_p, hw):
    i = pl.program_id(1)

    @pl.when(i == 0)
    def _():
        sum_ref[...] = jnp.zeros_like(sum_ref)
        ssq_ref[...] = jnp.zeros_like(ssq_ref)

    x = x_ref[...]                                           # (Cin, TP) f32
    h1 = _conv1_vpu(x, w1_ref, b1_ref)                       # VPU, no MXU
    h1 = jnp.where(h1 > 0, h1, 0.2 * h1)                     # LeakyReLU(0.2)
    # conv2: bf16 operands, f32 accumulation (the only MXU matmul in this pass)
    h2 = jnp.dot(w2b_ref[...], h1.astype(jnp.bfloat16),
                 preferred_element_type=jnp.float32)         # (2*ndf, TP)

    # Only the tile that straddles the image boundary needs masking.
    needs_mask = (i + 1) * tile_p > hw

    @pl.when(needs_mask)
    def _():
        col = i * tile_p + jax.lax.broadcasted_iota(jnp.int32, (1, tile_p), 1)
        # NaN-safe: out-of-bounds input columns may hold arbitrary (non-finite) bits.
        h2m = jnp.where(col < hw, h2, 0.0)
        sum_ref[...] += jnp.sum(h2m, axis=1, keepdims=True)
        ssq_ref[...] += jnp.sum(h2m * h2m, axis=1, keepdims=True)

    @pl.when(jnp.logical_not(needs_mask))
    def _():
        sum_ref[...] += jnp.sum(h2, axis=1, keepdims=True)
        ssq_ref[...] += jnp.sum(h2 * h2, axis=1, keepdims=True)


# -----------------------------------------------------------------------------
# Pass 2: recompute h1/h2, apply folded BN + LeakyReLU + conv3 (lane-dense out).
# Grid: (batch [parallel], pixel-tile [parallel]).
# -----------------------------------------------------------------------------
def _apply_kernel(x_ref, w1_ref, b1_ref, w2b_ref, scale_ref, shift_ref, w3_ref,
                  o_ref):
    x = x_ref[...]                                           # (Cin, TP) f32
    h1 = _conv1_vpu(x, w1_ref, b1_ref)
    h1 = jnp.where(h1 > 0, h1, 0.2 * h1)
    h2 = jnp.dot(w2b_ref[...], h1.astype(jnp.bfloat16),
                 preferred_element_type=jnp.float32)         # (2*ndf, TP)
    # BatchNorm folded into per-channel scale/shift (computed once in the wrapper)
    z = h2 * scale_ref[...] + shift_ref[...]
    # conv3 (Cout=1) with LeakyReLU folded into the weights:
    #   leaky(z) * w3 == z * where(z > 0, w3, 0.2 * w3)
    w3 = w3_ref[...]                                         # (2*ndf, 1)
    w3_eff = jnp.where(z > 0, w3, 0.2 * w3)
    o_ref[...] = jnp.sum(z * w3_eff, axis=0, keepdims=True)  # (1, TP) lane-dense


# -----------------------------------------------------------------------------
# Wrapper
# -----------------------------------------------------------------------------
def pixel_discriminator_forward(x_nchw, params, *, tile_pixels=8192, eps=1e-5):
    """x_nchw: (N, C, H, W) float32 -> (N, 1, H, W) float32."""
    N, C, H, W = x_nchw.shape
    HW = H * W
    w1, b1, w2, gamma, beta, w3 = params
    ndf = w1.shape[0]
    ndf2 = w2.shape[0]

    # Pixel tile: multiple of 128 (lanes), clamped to the per-image pixel count.
    if HW >= 128:
        tp = max(128, min(_round_up(tile_pixels, 128), (HW // 128) * 128))
    else:
        tp = HW                     # block == full dim (lane padding handled by layout)
    n_tiles = -(-HW // tp)

    # No transpose / pad: (N, C, H, W) -> (N, C, H*W) is a free reshape.
    x = x_nchw.reshape(N, C, HW)
    w2_bf16 = w2.astype(jnp.bfloat16)   # pre-cast once; f32 accumulation in-kernel

    grid = (N, n_tiles)
    x_spec = pl.BlockSpec((None, C, tp), lambda n, i: (n, 0, i))   # squeeze batch

    def full(shape):
        # Whole array as a single resident block (constant index_map -> fetched once).
        return pl.BlockSpec(shape, lambda n, i: (0,) * len(shape))

    # ---- pass 1: per-image partial BatchNorm statistics ---------------------
    ps, pss = pl.pallas_call(
        functools.partial(_stats_kernel, tile_p=tp, hw=HW),
        grid=grid,
        out_shape=(jax.ShapeDtypeStruct((N, ndf2, 1), jnp.float32),
                   jax.ShapeDtypeStruct((N, ndf2, 1), jnp.float32)),
        in_specs=[x_spec, full((ndf, C)), full((ndf, 1)), full((ndf2, ndf))],
        out_specs=(pl.BlockSpec((None, ndf2, 1), lambda n, i: (n, 0, 0)),
                   pl.BlockSpec((None, ndf2, 1), lambda n, i: (n, 0, 0))),
        compiler_params=pltpu.CompilerParams(
            dimension_semantics=("parallel", "arbitrary"),   # batch shards across TCs
            vmem_limit_bytes=32 * 1024 * 1024),
    )(x, w1, b1, w2_bf16)

    # Reduce per-image partials; fold BN into per-channel scale/shift (tiny XLA ops).
    P = N * HW
    s = jnp.sum(ps, axis=0)                                  # (ndf2, 1)
    ss = jnp.sum(pss, axis=0)
    mean = s / P
    var = jnp.maximum(ss / P - mean * mean, 0.0)
    inv_std = jax.lax.rsqrt(var + eps)
    scale = gamma * inv_std
    shift = beta - mean * scale

    # ---- pass 2: recompute h1/h2, normalize + LeakyReLU + conv3 -------------
    out = pl.pallas_call(
        _apply_kernel,
        grid=grid,
        out_shape=jax.ShapeDtypeStruct((N, 1, HW), jnp.float32),
        in_specs=[x_spec, full((ndf, C)), full((ndf, 1)), full((ndf2, ndf)),
                  full((ndf2, 1)), full((ndf2, 1)), full((ndf2, 1))],
        out_specs=pl.BlockSpec((None, 1, tp), lambda n, i: (n, 0, i)),
        compiler_params=pltpu.CompilerParams(
            dimension_semantics=("parallel", "parallel"),
            vmem_limit_bytes=32 * 1024 * 1024),
    )(x, w1, b1, w2_bf16, scale, shift, w3)

    return out.reshape(N, 1, H, W)


# -----------------------------------------------------------------------------
# Parameters & reference
# -----------------------------------------------------------------------------
def init_params(key, input_nc, ndf):
    """Deterministic synthetic params.  Conv weights stored channels-first:
    w1:(ndf,Cin) w2:(2ndf,ndf) w3:(2ndf,1); bias/gamma/beta stored (C, 1) so they
    broadcast over lanes inside the kernel."""
    k1, k2, k3, k4 = jax.random.split(key, 4)
    w1 = jax.random.uniform(k1, (ndf, input_nc), jnp.float32, -1.0, 1.0) * input_nc ** -0.5
    b1 = jax.random.uniform(k2, (ndf, 1), jnp.float32, -1.0, 1.0) * input_nc ** -0.5
    w2 = jax.random.uniform(k3, (2 * ndf, ndf), jnp.float32, -1.0, 1.0) * ndf ** -0.5
    gamma = jnp.ones((2 * ndf, 1), jnp.float32)   # BatchNorm2d default affine init
    beta = jnp.zeros((2 * ndf, 1), jnp.float32)
    w3 = jax.random.uniform(k4, (2 * ndf, 1), jnp.float32, -1.0, 1.0) * (2 * ndf) ** -0.5
    return (w1, b1, w2, gamma, beta, w3)


def _reference_forward(x_nchw, params, matmul_dtype=jnp.float32, eps=1e-5):
    """Pure-JAX reference.  matmul_dtype=bfloat16 mirrors the kernel's conv2
    bf16-operand / f32-accumulate precision exactly.  conv1/conv3 use HIGHEST
    precision to match the kernel's exact-f32 VPU computation."""
    w1, b1, w2, gamma, beta, w3 = params
    N, C, H, W = x_nchw.shape
    hi = jax.lax.Precision.HIGHEST
    x = jnp.transpose(x_nchw, (0, 2, 3, 1)).reshape(-1, C)        # (P, C)
    h1 = jnp.dot(x, w1.T, precision=hi) + b1.reshape(1, -1)
    h1 = jnp.where(h1 > 0, h1, 0.2 * h1)
    prec2 = hi if matmul_dtype == jnp.float32 else jax.lax.Precision.DEFAULT
    h2 = jnp.dot(h1.astype(matmul_dtype), w2.T.astype(matmul_dtype),
                 preferred_element_type=jnp.float32, precision=prec2)
    mean = jnp.mean(h2, axis=0, keepdims=True)
    var = jnp.mean((h2 - mean) ** 2, axis=0, keepdims=True)
    h2n = (h2 - mean) * jax.lax.rsqrt(var + eps) * gamma.reshape(1, -1) + beta.reshape(1, -1)
    h3 = jnp.where(h2n > 0, h2n, 0.2 * h2n)
    out = jnp.dot(h3, w3.reshape(-1, 1), precision=hi)
    return jnp.transpose(out.reshape(N, H, W, 1), (0, 3, 1, 2))


if __name__ == "__main__":
    key = jax.random.PRNGKey(0)
    kx, kp = jax.random.split(key)

    # Small shapes consistent with the module's forward (NCHW input).  W=20 keeps the
    # per-image pixel count (320) off a multiple of 128 so the ragged-tail masking,
    # multi-tile stat accumulation, and per-image partial-stats reduction are all hit.
    N, input_nc, H, W = 2, 4, 16, 20
    ndf = 64

    x = jax.random.normal(kx, (N, input_nc, H, W), jnp.float32)
    params = init_params(kp, input_nc, ndf)

    y_ref_bf16 = _reference_forward(x, params, matmul_dtype=jnp.bfloat16)
    y_ref_f32 = _reference_forward(x, params, matmul_dtype=jnp.float32)

    # Run twice: tiny tile (128 -> 3 tiles/image, ragged tail) and the default tile
    # (clamped to the image, 2 tiles/image with a ragged tail).
    for tile in (128, 8192):
        y = pixel_discriminator_forward(x, params, tile_pixels=tile)
        y = jax.block_until_ready(y)
        assert y.shape == (N, 1, H, W), y.shape

        # Tight check vs a reference using the same conv2 precision (bf16 operands,
        # f32 accumulation).
        assert jnp.allclose(y, y_ref_bf16, atol=1e-3, rtol=1e-3), (
            "tile=%d mismatch vs matched-precision reference: max|diff|=%s"
            % (tile, float(jnp.max(jnp.abs(y - y_ref_bf16)))))

        # Sanity check vs the full-f32 module semantics (bf16-operand conv2 only
        # perturbs the result slightly).
        assert jnp.allclose(y, y_ref_f32, atol=5e-2, rtol=5e-2), (
            "tile=%d mismatch vs f32 reference: max|diff|=%s"
            % (tile, float(jnp.max(jnp.abs(y - y_ref_f32)))))

    print("KERNEL_OK")
</pallas_src>

<mosaic_0001>
module attributes {stable_mosaic.version = 11 : i64} {
  func.func @_stats_kernel(%arg0: i32, %arg1: i32, %arg2: memref<1x4x128xf32, #tpu.memory_space<vmem>>, %arg3: memref<64x4xf32, #tpu.memory_space<vmem>>, %arg4: memref<64x1xf32, #tpu.memory_space<vmem>>, %arg5: memref<128x64xbf16, #tpu.memory_space<vmem>>, %arg6: memref<1x128x1xf32, #tpu.memory_space<vmem>>, %arg7: memref<1x128x1xf32, #tpu.memory_space<vmem>>) attributes {dimension_semantics = [#tpu.dimension_semantics<parallel>, #tpu.dimension_semantics<arbitrary>], iteration_bounds = array<i64: 2, 3>, scalar_prefetch = 0 : i64, scratch_operands = 0 : i64, tpu.core_type = #tpu.core_type<tc>, window_params = [{transform_indices = @transform_0, window_bounds = array<i64: 1, 4, 128>}, {pipeline_mode = #tpu.pipeline_mode<synchronous>, transform_indices = @transform_1, window_bounds = array<i64: 64, 4>}, {pipeline_mode = #tpu.pipeline_mode<synchronous>, transform_indices = @transform_2, window_bounds = array<i64: 64, 1>}, {pipeline_mode = #tpu.pipeline_mode<synchronous>, transform_indices = @transform_3, window_bounds = array<i64: 128, 64>}, {transform_indices = @transform_4, window_bounds = array<i64: 1, 128, 1>}, {transform_indices = @transform_5, window_bounds = array<i64: 1, 128, 1>}]} {
    %c0_i32 = arith.constant 0 : i32
    %0 = arith.cmpi eq, %arg1, %c0_i32 : i32
    %1 = arith.extui %0 : i1 to i32
    %c0_i32_0 = arith.constant 0 : i32
    %2 = arith.cmpi ne, %1, %c0_i32_0 : i32
    scf.if %2 {
      %cst_13 = arith.constant 0.000000e+00 : f32
      %48 = vector.broadcast %cst_13 : f32 to vector<128x1xf32>
      %c0_14 = arith.constant 0 : index
      %c0_15 = arith.constant 0 : index
      %c0_16 = arith.constant 0 : index
      %49 = vector.load %arg6[%c0_14, %c0_15, %c0_16] : memref<1x128x1xf32, #tpu.memory_space<vmem>>, vector<1x128x1xf32>
      %50 = vector.shape_cast %49 : vector<1x128x1xf32> to vector<128x1xf32>
      %51 = vector.shape_cast %48 : vector<128x1xf32> to vector<1x128x1xf32>
      tpu.vector_store %arg6[%c0_14, %c0_15, %c0_16], %51 {strides = array<i32>} : memref<1x128x1xf32, #tpu.memory_space<vmem>>, vector<1x128x1xf32>,
      %cst_17 = arith.constant 0.000000e+00 : f32
      %52 = vector.broadcast %cst_17 : f32 to vector<128x1xf32>
      %c0_18 = arith.constant 0 : index
      %c0_19 = arith.constant 0 : index
      %c0_20 = arith.constant 0 : index
      %53 = vector.load %arg7[%c0_18, %c0_19, %c0_20] : memref<1x128x1xf32, #tpu.memory_space<vmem>>, vector<1x128x1xf32>
      %54 = vector.shape_cast %53 : vector<1x128x1xf32> to vector<128x1xf32>
      %55 = vector.shape_cast %52 : vector<128x1xf32> to vector<1x128x1xf32>
      tpu.vector_store %arg7[%c0_18, %c0_19, %c0_20], %55 {strides = array<i32>} : memref<1x128x1xf32, #tpu.memory_space<vmem>>, vector<1x128x1xf32>,
    } else {
    }
    %c0 = arith.constant 0 : index
    %c0_1 = arith.constant 0 : index
    %c0_2 = arith.constant 0 : index
    %3 = vector.load %arg2[%c0, %c0_1, %c0_2] : memref<1x4x128xf32, #tpu.memory_space<vmem>>, vector<1x4x128xf32>
    %4 = vector.shape_cast %3 : vector<1x4x128xf32> to vector<4x128xf32>
    %c0_3 = arith.constant 0 : index
    %c0_4 = arith.constant 0 : index
    %5 = vector.load %arg3[%c0_3, %c0_4] : memref<64x4xf32, #tpu.memory_space<vmem>>, vector<64x4xf32>
    %c0_5 = arith.constant 0 : index
    %c0_6 = arith.constant 0 : index
    %6 = vector.load %arg4[%c0_5, %c0_6] : memref<64x1xf32, #tpu.memory_space<vmem>>, vector<64x1xf32>
    %7 = vector.extract_strided_slice %5 {offsets = [0, 0], sizes = [64, 1], strides = [1, 1]} : vector<64x4xf32> to vector<64x1xf32>
    %8 = vector.extract_strided_slice %4 {offsets = [0, 0], sizes = [1, 128], strides = [1, 1]} : vector<4x128xf32> to vector<1x128xf32>
    %9 = vector.broadcast %7 : vector<64x1xf32> to vector<64x128xf32>
    %10 = vector.broadcast %8 : vector<1x128xf32> to vector<64x128xf32>
    %11 = arith.mulf %9, %10 : vector<64x128xf32>
    %12 = vector.broadcast %6 : vector<64x1xf32> to vector<64x128xf32>
    %13 = arith.addf %12, %11 : vector<64x128xf32>
    %14 = vector.extract_strided_slice %5 {offsets = [0, 1], sizes = [64, 1], strides = [1, 1]} : vector<64x4xf32> to vector<64x1xf32>
    %15 = vector.extract_strided_slice %4 {offsets = [1, 0], sizes = [1, 128], strides = [1, 1]} : vector<4x128xf32> to vector<1x128xf32>
    %16 = vector.broadcast %14 : vector<64x1xf32> to vector<64x128xf32>
    %17 = vector.broadcast %15 : vector<1x128xf32> to vector<64x128xf32>
    %18 = arith.mulf %16, %17 : vector<64x128xf32>
    %19 = arith.addf %13, %18 : vector<64x128xf32>
    %20 = vector.extract_strided_slice %5 {offsets = [0, 2], sizes = [64, 1], strides = [1, 1]} : vector<64x4xf32> to vector<64x1xf32>
    %21 = vector.extract_strided_slice %4 {offsets = [2, 0], sizes = [1, 128], strides = [1, 1]} : vector<4x128xf32> to vector<1x128xf32>
    %22 = vector.broadcast %20 : vector<64x1xf32> to vector<64x128xf32>
    %23 = vector.broadcast %21 : vector<1x128xf32> to vector<64x128xf32>
    %24 = arith.mulf %22, %23 : vector<64x128xf32>
    %25 = arith.addf %19, %24 : vector<64x128xf32>
    %26 = vector.extract_strided_slice %5 {offsets = [0, 3], sizes = [64, 1], strides = [1, 1]} : vector<64x4xf32> to vector<64x1xf32>
    %27 = vector.extract_strided_slice %4 {offsets = [3, 0], sizes = [1, 128], strides = [1, 1]} : vector<4x128xf32> to vector<1x128xf32>
    %28 = vector.broadcast %26 : vector<64x1xf32> to vector<64x128xf32>
    %29 = vector.broadcast %27 : vector<1x128xf32> to vector<64x128xf32>
    %30 = arith.mulf %28, %29 : vector<64x128xf32>
    %31 = arith.addf %25, %30 : vector<64x128xf32>
    %cst = arith.constant 0.000000e+00 : f32
    %32 = vector.broadcast %cst : f32 to vector<64x128xf32>
    %33 = arith.cmpf ogt, %31, %32 : vector<64x128xf32>
    %cst_7 = arith.constant 2.000000e-01 : f32
    %34 = vector.broadcast %cst_7 : f32 to vector<64x128xf32>
    %35 = arith.mulf %34, %31 : vector<64x128xf32>
    %36 = arith.select %33, %31, %35 : vector<64x128xi1>, vector<64x128xf32>
    %c0_8 = arith.constant 0 : index
    %c0_9 = arith.constant 0 : index
    %37 = vector.load %arg5[%c0_8, %c0_9] : memref<128x64xbf16, #tpu.memory_space<vmem>>, vector<128x64xbf16>
    %38 = arith.truncf %36 : vector<64x128xf32> to vector<64x128xbf16>
    %cst_10 = arith.constant dense<0.000000e+00> : vector<128x128xf32>
    %39 = tpu.matmul %37, %38, %cst_10 {dimension_numbers = #tpu.dot_dimension_numbers<[1], [0], [0], [1], [0, 0, 1, 1], [], []>} : vector<128x64xbf16>, vector<64x128xbf16>, vector<128x128xf32> -> vector<128x128xf32>
    %c1_i32 = arith.constant 1 : i32
    %40 = arith.addi %arg1, %c1_i32 : i32
    %c128_i32 = arith.constant 128 : i32
    %41 = arith.muli %40, %c128_i32 : i32
    %c320_i32 = arith.constant 320 : i32
    %42 = arith.cmpi sgt, %41, %c320_i32 : i32
    %43 = arith.extui %42 : i1 to i32
    %c0_i32_11 = arith.constant 0 : i32
    %44 = arith.cmpi ne, %43, %c0_i32_11 : i32
    scf.if %44 {
      %c128_i32_13 = arith.constant 128 : i32
      %48 = arith.muli %arg1, %c128_i32_13 : i32
      %49 = tpu.iota {dimensions = array<i32: 1>} : vector<1x128xi32>
      %50 = vector.broadcast %48 : i32 to vector<1x128xi32>
      %51 = arith.addi %50, %49 : vector<1x128xi32>
      %c320_i32_14 = arith.constant 320 : i32
      %52 = vector.broadcast %c320_i32_14 : i32 to vector<1x128xi32>
      %53 = arith.cmpi slt, %51, %52 : vector<1x128xi32>
      %cst_15 = arith.constant 0.000000e+00 : f32
      %54 = vector.shape_cast %53 : vector<1x128xi1> to vector<1x128xi1>
      %55 = vector.broadcast %54 : vector<1x128xi1> to vector<128x128xi1>
      %56 = vector.broadcast %cst_15 : f32 to vector<128x128xf32>
      %57 = arith.select %55, %39, %56 : vector<128x128xi1>, vector<128x128xf32>
      %c0_16 = arith.constant 0 : index
      %c0_17 = arith.constant 0 : index
      %c0_18 = arith.constant 0 : index
      %58 = vector.load %arg6[%c0_16, %c0_17, %c0_18] : memref<1x128x1xf32, #tpu.memory_space<vmem>>, vector<1x128x1xf32>
      %59 = vector.shape_cast %58 : vector<1x128x1xf32> to vector<128x1xf32>
      %cst_19 = arith.constant dense<0.000000e+00> : vector<128xf32>
      %60 = vector.multi_reduction <add>, %57, %cst_19 [1] : vector<128x128xf32> to vector<128xf32>
      %61 = vector.shape_cast %60 : vector<128xf32> to vector<128x1xf32>
      %62 = arith.addf %59, %61 : vector<128x1xf32>
      %c0_20 = arith.constant 0 : index
      %c0_21 = arith.constant 0 : index
      %c0_22 = arith.constant 0 : index
      %63 = vector.load %arg6[%c0_20, %c0_21, %c0_22] : memref<1x128x1xf32, #tpu.memory_space<vmem>>, vector<1x128x1xf32>
      %64 = vector.shape_cast %63 : vector<1x128x1xf32> to vector<128x1xf32>
      %65 = vector.shape_cast %62 : vector<128x1xf32> to vector<1x128x1xf32>
      tpu.vector_store %arg6[%c0_20, %c0_21, %c0_22], %65 {strides = array<i32>} : memref<1x128x1xf32, #tpu.memory_space<vmem>>, vector<1x128x1xf32>,
      %c0_23 = arith.constant 0 : index
      %c0_24 = arith.constant 0 : index
      %c0_25 = arith.constant 0 : index
      %66 = vector.load %arg7[%c0_23, %c0_24, %c0_25] : memref<1x128x1xf32, #tpu.memory_space<vmem>>, vector<1x128x1xf32>
      %67 = vector.shape_cast %66 : vector<1x128x1xf32> to vector<128x1xf32>
      %68 = arith.mulf %57, %57 : vector<128x128xf32>
      %cst_26 = arith.constant dense<0.000000e+00> : vector<128xf32>
      %69 = vector.multi_reduction <add>, %68, %cst_26 [1] : vector<128x128xf32> to vector<128xf32>
      %70 = vector.shape_cast %69 : vector<128xf32> to vector<128x1xf32>
      %71 = arith.addf %67, %70 : vector<128x1xf32>
      %c0_27 = arith.constant 0 : index
      %c0_28 = arith.constant 0 : index
      %c0_29 = arith.constant 0 : index
      %72 = vector.load %arg7[%c0_27, %c0_28, %c0_29] : memref<1x128x1xf32, #tpu.memory_space<vmem>>, vector<1x128x1xf32>
      %73 = vector.shape_cast %72 : vector<1x128x1xf32> to vector<128x1xf32>
      %74 = vector.shape_cast %71 : vector<128x1xf32> to vector<1x128x1xf32>
      tpu.vector_store %arg7[%c0_27, %c0_28, %c0_29], %74 {strides = array<i32>} : memref<1x128x1xf32, #tpu.memory_space<vmem>>, vector<1x128x1xf32>,
    } else {
    }
    %true = arith.constant true
    %45 = arith.xori %42, %true : i1
    %46 = arith.extui %45 : i1 to i32
    %c0_i32_12 = arith.constant 0 : i32
    %47 = arith.cmpi ne, %46, %c0_i32_12 : i32
    scf.if %47 {
      %c0_13 = arith.constant 0 : index
      %c0_14 = arith.constant 0 : index
      %c0_15 = arith.constant 0 : index
      %48 = vector.load %arg6[%c0_13, %c0_14, %c0_15] : memref<1x128x1xf32, #tpu.memory_space<vmem>>, vector<1x128x1xf32>
      %49 = vector.shape_cast %48 : vector<1x128x1xf32> to vector<128x1xf32>
      %cst_16 = arith.constant dense<0.000000e+00> : vector<128xf32>
      %50 = vector.multi_reduction <add>, %39, %cst_16 [1] : vector<128x128xf32> to vector<128xf32>
      %51 = vector.shape_cast %50 : vector<128xf32> to vector<128x1xf32>
      %52 = arith.addf %49, %51 : vector<128x1xf32>
      %c0_17 = arith.constant 0 : index
      %c0_18 = arith.constant 0 : index
      %c0_19 = arith.constant 0 : index
      %53 = vector.load %arg6[%c0_17, %c0_18, %c0_19] : memref<1x128x1xf32, #tpu.memory_space<vmem>>, vector<1x128x1xf32>
      %54 = vector.shape_cast %53 : vector<1x128x1xf32> to vector<128x1xf32>
      %55 = vector.shape_cast %52 : vector<128x1xf32> to vector<1x128x1xf32>
      tpu.vector_store %arg6[%c0_17, %c0_18, %c0_19], %55 {strides = array<i32>} : memref<1x128x1xf32, #tpu.memory_space<vmem>>, vector<1x128x1xf32>,
      %c0_20 = arith.constant 0 : index
      %c0_21 = arith.constant 0 : index
      %c0_22 = arith.constant 0 : index
      %56 = vector.load %arg7[%c0_20, %c0_21, %c0_22] : memref<1x128x1xf32, #tpu.memory_space<vmem>>, vector<1x128x1xf32>
      %57 = vector.shape_cast %56 : vector<1x128x1xf32> to vector<128x1xf32>
      %58 = arith.mulf %39, %39 : vector<128x128xf32>
      %cst_23 = arith.constant dense<0.000000e+00> : vector<128xf32>
      %59 = vector.multi_reduction <add>, %58, %cst_23 [1] : vector<128x128xf32> to vector<128xf32>
      %60 = vector.shape_cast %59 : vector<128xf32> to vector<128x1xf32>
      %61 = arith.addf %57, %60 : vector<128x1xf32>
      %c0_24 = arith.constant 0 : index
      %c0_25 = arith.constant 0 : index
      %c0_26 = arith.constant 0 : index
      %62 = vector.load %arg7[%c0_24, %c0_25, %c0_26] : memref<1x128x1xf32, #tpu.memory_space<vmem>>, vector<1x128x1xf32>
      %63 = vector.shape_cast %62 : vector<1x128x1xf32> to vector<128x1xf32>
      %64 = vector.shape_cast %61 : vector<128x1xf32> to vector<1x128x1xf32>
      tpu.vector_store %arg7[%c0_24, %c0_25, %c0_26], %64 {strides = array<i32>} : memref<1x128x1xf32, #tpu.memory_space<vmem>>, vector<1x128x1xf32>,
    } else {
    }
    return
  }
  func.func @transform_0(%arg0: i32, %arg1: i32) -> (i32, i32, i32) {
    %c0_i32 = arith.constant 0 : i32
    %c0_i32_0 = arith.constant 0 : i32
    return %arg0, %c0_i32, %arg1 : i32, i32, i32
  }
  func.func @transform_1(%arg0: i32, %arg1: i32) -> (i32, i32) {
    %c0_i32 = arith.constant 0 : i32
    %c0_i32_0 = arith.constant 0 : i32
    %c0_i32_1 = arith.constant 0 : i32
    return %c0_i32, %c0_i32_0 : i32, i32
  }
  func.func @transform_2(%arg0: i32, %arg1: i32) -> (i32, i32) {
    %c0_i32 = arith.constant 0 : i32
    %c0_i32_0 = arith.constant 0 : i32
    %c0_i32_1 = arith.constant 0 : i32
    return %c0_i32, %c0_i32_0 : i32, i32
  }
  func.func @transform_3(%arg0: i32, %arg1: i32) -> (i32, i32) {
    %c0_i32 = arith.constant 0 : i32
    %c0_i32_0 = arith.constant 0 : i32
    %c0_i32_1 = arith.constant 0 : i32
    return %c0_i32, %c0_i32_0 : i32, i32
  }
  func.func @transform_4(%arg0: i32, %arg1: i32) -> (i32, i32, i32) {
    %c0_i32 = arith.constant 0 : i32
    %c0_i32_0 = arith.constant 0 : i32
    %c0_i32_1 = arith.constant 0 : i32
    return %arg0, %c0_i32, %c0_i32_0 : i32, i32, i32
  }
  func.func @transform_5(%arg0: i32, %arg1: i32) -> (i32, i32, i32) {
    %c0_i32 = arith.constant 0 : i32
    %c0_i32_0 = arith.constant 0 : i32
    %c0_i32_1 = arith.constant 0 : i32
    return %arg0, %c0_i32, %c0_i32_0 : i32, i32, i32
  }
}

</mosaic_0001>

<bundles_post_ra>
// kernel: tpu_custom_call.1
= control target key start
LH: loop header
LB: loop body
LE: loop exit
PB: predicated region body
PF: predicated region fallthrough
CT: control target
= control target key end

     0   :  { %s1504_s18 = smov 0   ;;  %s1506_s19 = smov 0   ;;  %s2096_s0 = inlined_call_operand.vmem [shape: f32[2,4,320], index: 0, kind: input, shape index: {}]   ;;  %s2097_s1 = inlined_call_operand.vmem [shape: f32[64,4], index: 1, kind: input, shape index: {}]   ;;  %s2098_s2 = inlined_call_operand.vmem [shape: f32[64,1], index: 2, kind: input, shape index: {}]   ;;  %s2099_s3 = inlined_call_operand.vmem [shape: bf16[128,64], index: 3, kind: input, shape index: {}]   ;;  %s2100_s4 = inlined_call_operand.vmem [shape: f32[2,128,1], index: 4, kind: output, shape index: {0}]   ;;  %s2101_s5 = inlined_call_operand.vmem [shape: f32[2,128,1], index: 5, kind: output, shape index: {1}]  }
   0x1   :  { %s1508_s20 = smov 0   ;;  %s1510_s21 = smov 0  }
   0x2   :  { %s1512_s22 = smov 0  }
   0x3 LB: > { %s25_s23 = sadd.s32 1, %s1459_s20  ;;  %s28_s24 = sadd.s32 1, %s1463_s21  ;;  %s1467_s22 = sphi %s1512_s22, %s16_s22   ;;  %s1463_s21 = sphi %s1510_s21, %s2105_s21   ;;  %s1459_s20 = sphi %s1508_s20, %s2104_s20   ;;  %s1455_s19 = sphi %s1506_s19, %s2103_s19   ;;  %s1451_s18 = sphi %s1504_s18, %s2102_s18  }
   0x4   : > { %p26_p0 = scmp.ge.s32.totalorder %s25_s23, 3  ;;  %p1275_p1 = scmp.ge.s32.totalorder %s1467_s22, 1 }
   0x5   : > { %p207_p2 = scmp.lt.s32.totalorder %s1467_s22, 7 }
   0x6   : > { %s2107_s23 = smov (%p26_p0, %s25_s23), 0  ;;  %s2109_s24 = smov (!%p26_p0, %s28_s24), %s1463_s21 }
   0x7   : > { %p208_p3 = pnand %p1275_p1, %p207_p2  ;;  %p30_p4 = scmp.ge.s32.totalorder %s2109_s24, 2 }
   0x8   : > { %p243_p5 = scmp.lt.s32.totalorder (!%p208_p3), %s1455_s19, 1  ;;  %p245_p6 = scmp.lt.s32.totalorder (!%p208_p3), %s1451_s18, 2 }
   0x9   : > { %s2111_s24 = smov (%p30_p4, %s2109_s24), 0  ;;  %211 = sbr.rel (%p208_p3) target bundleno = 920 (0x398), region = 36 }
   0xa   : > { %p1281_p7 = scmp.ne.s32.totalorder (!%p208_p3), %s1451_s18, 0 }
  0x10   : > { %s2113_s19 = smov (!%p243_p5, %s1455_s19), 1  ;;  %265 = sbr.rel (%p1281_p7) target bundleno = 36 (0x24), region = 40 }
  0x11   : > { %s246_s25 = scalar_select %p245_p6, %s1451_s18, 2 }
  0x12   : > { %s1352_s26 = smul.u32 3, %s2113_s19  ;;  %s1304_s27 = sshll.u32 %s2113_s19, 7  ;;  %vm266_vm0 = vcmask (!%p1281_p7), 7168   ;;  %v1469_v0 = vmov (!%p1281_p7), 0.0  }
  0x13   : > { %s1541_s30 = scalar_lea.vmem %s2100_s4, %s1304_s27  ;;  %s1546_s8 = scalar_lea.vmem %s2101_s5, %s1304_s27 }
  0x14   : > { %s248_s9 = sadd.s32 %s1352_s26, %s246_s25  ;;  %267 = vst.msk [vmem:[%s1541_s30] sm:$0xff] (!%p1281_p7), %vm266_vm0, %v1469_v0  ;;  %268 = vst.msk [vmem:[%s1541_s30 + $0x8] sm:$0xff] (!%p1281_p7), %vm266_vm0, %v1469_v0 }
  0x15   : > { %s1276_s10 = sshll.u32 %s248_s9, 2  ;;  %269 = vst.msk [vmem:[%s1541_s30 + $0x10] sm:$0xff] (!%p1281_p7), %vm266_vm0, %v1469_v0  ;;  %270 = vst.msk [vmem:[%s1541_s30 + $0x18] sm:$0xff] (!%p1281_p7), %vm266_vm0, %v1469_v0 }
  0x16   : > { %s1551_s13 = scalar_lea.vmem %s2096_s0, %s1276_s10  ;;  %271 = vst.msk [vmem:[%s1541_s30 + $0x20] sm:$0xff] (!%p1281_p7), %vm266_vm0, %v1469_v0  ;;  %272 = vst.msk [vmem:[%s1541_s30 + $0x28] sm:$0xff] (!%p1281_p7), %vm266_vm0, %v1469_v0 }
  0x17   : > { %273 = vst.msk [vmem:[%s1541_s30 + $0x30] sm:$0xff] %vm266_vm0, %v1469_v0  ;;  %274 = vst.msk [vmem:[%s1541_s30 + $0x38] sm:$0xff] %vm266_vm0, %v1469_v0 }
  0x18   : > { %275 = vst.msk [vmem:[%s1541_s30 + $0x40] sm:$0xff] %vm266_vm0, %v1469_v0  ;;  %276 = vst.msk [vmem:[%s1541_s30 + $0x48] sm:$0xff] %vm266_vm0, %v1469_v0 }
  0x19   : > { %277 = vst.msk [vmem:[%s1541_s30 + $0x50] sm:$0xff] %vm266_vm0, %v1469_v0  ;;  %278 = vst.msk [vmem:[%s1541_s30 + $0x58] sm:$0xff] %vm266_vm0, %v1469_v0 }
  0x1a   : > { %279 = vst.msk [vmem:[%s1541_s30 + $0x60] sm:$0xff] %vm266_vm0, %v1469_v0  ;;  %280 = vst.msk [vmem:[%s1541_s30 + $0x68] sm:$0xff] %vm266_vm0, %v1469_v0 }
  0x1b   : > { %281 = vst.msk [vmem:[%s1541_s30 + $0x70] sm:$0xff] %vm266_vm0, %v1469_v0  ;;  %282 = vst.msk [vmem:[%s1541_s30 + $0x78] sm:$0xff] %vm266_vm0, %v1469_v0 }
  0x1c   : > { %283 = vst.msk [vmem:[%s1546_s8] sm:$0xff] %vm266_vm0, %v1469_v0  ;;  %284 = vst.msk [vmem:[%s1546_s8 + $0x8] sm:$0xff] %vm266_vm0, %v1469_v0 }
  0x1d   : > { %285 = vst.msk [vmem:[%s1546_s8 + $0x10] sm:$0xff] %vm266_vm0, %v1469_v0  ;;  %286 = vst.msk [vmem:[%s1546_s8 + $0x18] sm:$0xff] %vm266_vm0, %v1469_v0 }
  0x1e   : > { %287 = vst.msk [vmem:[%s1546_s8 + $0x20] sm:$0xff] %vm266_vm0, %v1469_v0  ;;  %288 = vst.msk [vmem:[%s1546_s8 + $0x28] sm:$0xff] %vm266_vm0, %v1469_v0 }
  0x1f   : > { %289 = vst.msk [vmem:[%s1546_s8 + $0x30] sm:$0xff] %vm266_vm0, %v1469_v0  ;;  %290 = vst.msk [vmem:[%s1546_s8 + $0x38] sm:$0xff] %vm266_vm0, %v1469_v0 }
  0x20   : > { %291 = vst.msk [vmem:[%s1546_s8 + $0x40] sm:$0xff] %vm266_vm0, %v1469_v0  ;;  %292 = vst.msk [vmem:[%s1546_s8 + $0x48] sm:$0xff] %vm266_vm0, %v1469_v0 }
  0x21   : > { %293 = vst.msk [vmem:[%s1546_s8 + $0x50] sm:$0xff] %vm266_vm0, %v1469_v0  ;;  %294 = vst.msk [vmem:[%s1546_s8 + $0x58] sm:$0xff] %vm266_vm0, %v1469_v0 }
  0x22   : > { %295 = vst.msk [vmem:[%s1546_s8 + $0x60] sm:$0xff] %vm266_vm0, %v1469_v0  ;;  %296 = vst.msk [vmem:[%s1546_s8 + $0x68] sm:$0xff] %vm266_vm0, %v1469_v0 }
  0x23   : > { %297 = vst.msk [vmem:[%s1546_s8 + $0x70] sm:$0xff] %vm266_vm0, %v1469_v0  ;;  %298 = vst.msk [vmem:[%s1546_s8 + $0x78] sm:$0xff] %vm266_vm0, %v1469_v0 }
  0x24 PF: > { %v308_v1 = vld [vmem:[%s2098_s2] sm:$0xff]  ;;  %v302_v2 = vld [vmem:[%s2097_s1 + $0x10] sm:$0xff]  ;;  %v1470_v3 = vmov 2   ;;  %v1471_v4 = vmov 0   ;;  %v309_v5 = vld [vmem:[%s2098_s2 + $0x8] sm:$0xff]  ;;  %v1472_v8 = vmov 1   ;;  %v356_v31 = vlaneseq }
  0x25   : > { %1406 = vset.pattern.permute.xlu0 %v1470_v3  ;;  %1398 = vset.pattern.permute.xlu1 %v1471_v4  ;;  %v300_v6 = vld [vmem:[%s2097_s1] sm:$0xff]  ;;  %v301_v7 = vld [vmem:[%s2097_s1 + $0x8] sm:$0xff]  ;;  %v303_v9 = vld [vmem:[%s2097_s1 + $0x18] sm:$0xff]  ;;  %v1473_v15 = vmov 3   ;;  %vm656_vm1 = vcmask 523264   ;;  %s1306_s12 = sshll.u32 %s1451_s18, 7 }
  0x26   : > { %370 = vperm.xlu1 %1398, %v308_v1   ;;  %477 = vperm.xlu0 %1406, %v302_v2   ;;  %v310_v10 = vld [vmem:[%s2098_s2 + $0x10] sm:$0xff]  ;;  %v313_v11 = vld [vmem:[%s2098_s2 + $0x28] sm:$0xff]  ;;  %v307_v12 = vld [vmem:[%s2097_s1 + $0x38] sm:$0xff]  ;;  %v357_v34 = vshrl.u32 %v356_v31, 7  ;;  %s1772_s14 = sadd.s32 128, %s1306_s12 }
  0x27   : > { %v311_v13 = vld [vmem:[%s2098_s2 + $0x18] sm:$0xff]  ;;  %v314_v14 = vld [vmem:[%s2098_s2 + $0x30] sm:$0xff]  ;;  %v304_v17 = vld [vmem:[%s2097_s1 + $0x20] sm:$0xff]  ;;  %p1299_p8 = scmp.le.s32.totalorder %s1772_s14, 320 }
  0x28   : > { %v306_v16 = vld [vmem:[%s2097_s1 + $0x30] sm:$0xff]  ;;  %v305_v18 = vld [vmem:[%s2097_s1 + $0x28] sm:$0xff]  ;;  %v312_v19 = vld [vmem:[%s2098_s2 + $0x20] sm:$0xff]  ;;  %v358_v37 = vsub.s32 0, %v357_v34  ;;  %v450_v42 = vsub.s32 1, %v357_v34  ;;  %v502_v44 = vsub.s32 2, %v357_v34 }
  0x29   : > { %v315_v20 = vld [vmem:[%s2098_s2 + $0x38] sm:$0xff]  ;;  %v1421_v21 = vld [vmem:[%s2099_s3] sm:$0xff]   ;;  %v554_v49 = vsub.s32 3, %v357_v34  ;;  %vm872_vm11 = vcmask (!%p1299_p8), 7168  }
  0x2a   : > { %375 = vperm.xlu1 %1398, %v309_v5   ;;  %1407 = vset.pattern.permute.xlu0 %v1471_v4  ;;  %v1422_v22 = vld [vmem:[%s2099_s3 + $0x20] sm:$0xff]  }
  0x2b   : > { %318 = vperm.xlu0 %1407, %v300_v6   ;;  %1328 = vmatprep.mubr.msk.bf16.mxu0 %vm656_vm1, %v1421_v21  ;;  %v299_v38 = vld [vmem:[%s1551_s13] sm:$0xf] }
  0x2c   : > { %1336 = vmatprep.mubr.msk.bf16.mxu1 %vm656_vm1, %v1422_v22  ;;  %v1697_v40 = vrot.slane %v299_v38, %v358_v37  ;;  %v1702_v46 = vrot.slane %v299_v38, %v450_v42  ;;  %v1705_v51 = vrot.slane %v299_v38, %v502_v44  ;;  %v1708_v57 = vrot.slane %v299_v38, %v554_v49 }
  0x2e   : > { %1399 = vset.pattern.permute.xlu1 %v1472_v8 }
  0x2f   : > { %421 = vperm.xlu1 %1399, %v301_v7   ;;  %323 = vperm.xlu0 %1407, %v301_v7  }
  0x33   : > { %1400 = vset.pattern.permute.xlu1 %v1471_v4  ;;  %333 = vperm.xlu0 %1407, %v303_v9  }
  0x34   : > { %328 = vperm.xlu1 %1400, %v302_v2  }
  0x37   : > { %380 = vperm.xlu0 %1407, %v310_v10  }
  0x38   : > { %1401 = vset.pattern.permute.xlu1 %v1470_v3 }
  0x39   : > { %469 = vperm.xlu1 %1401, %v300_v6  }
  0x3b   : > { %395 = vperm.xlu0 %1407, %v313_v11  }
  0x3d   : > { %473 = vperm.xlu1 %1401, %v301_v7  }
  0x3f   : > { %353 = vperm.xlu0 %1407, %v307_v12  }
  0x41   : > { %1402 = vset.pattern.permute.xlu1 %v1471_v4 }
  0x42   : > { %385 = vperm.xlu1 %1402, %v311_v13  }
  0x43   : > { %400 = vperm.xlu0 %1407, %v314_v14  }
  0x46   : > { %1403 = vset.pattern.permute.xlu1 %v1472_v8 }
  0x47   : > { %1414 = vset.pattern.permute.xlu0 %v1472_v8  ;;  %429 = vperm.xlu1 %1403, %v303_v9  }
  0x48   : > { %417 = vperm.xlu0 %1414, %v300_v6  }
  0x4b   : > { %1404 = vset.pattern.permute.xlu1 %v1473_v15 }
  0x4c   : > { %425 = vperm.xlu0 %1414, %v302_v2   ;;  %521 = vperm.xlu1 %1404, %v300_v6  }
  0x50   : > { %441 = vperm.xlu0 %1414, %v306_v16   ;;  %1405 = vset.pattern.permute.xlu1 %v1471_v4 }
  0x51   : > { %338 = vperm.xlu1 %1405, %v304_v17  }
  0x54   : > { %1416 = vset.pattern.permute.xlu0 %v1473_v15 }
  0x55   : > { %525 = vperm.xlu0 %1416, %v301_v7   ;;  %343 = vperm.xlu1 %1405, %v305_v18  }
  0x59   : > { %529 = vperm.xlu0 %1416, %v302_v2   ;;  %1408 = vset.pattern.permute.xlu1 %v1470_v3 }
  0x5a   : > { %481 = vperm.xlu1 %1408, %v303_v9  }
  0x5d   : > { %541 = vperm.xlu0 %1416, %v305_v18  }
  0x5e   : > { %1409 = vset.pattern.permute.xlu1 %v1471_v4 }
  0x5f   : > { %390 = vperm.xlu1 %1409, %v312_v19  }
  0x61   : > { %545 = vperm.xlu0 %1416, %v306_v16  }
  0x63   : > { %1410 = vset.pattern.permute.xlu1 %v1472_v8 }
  0x64   : > { %433 = vperm.xlu1 %1410, %v304_v17  }
  0x68   : > { %437 = vperm.xlu1 %1410, %v305_v18  }
  0x6c   : > { %1411 = vset.pattern.permute.xlu1 %v1473_v15 }
  0x6d   : > { %533 = vperm.xlu1 %1411, %v303_v9  }
  0x71   : > { %1412 = vset.pattern.permute.xlu1 %v1471_v4 }
  0x72   : > { %348 = vperm.xlu1 %1412, %v306_v16  }
  0x76   : > { %1413 = vset.pattern.permute.xlu1 %v1470_v3 }
  0x77   : > { %485 = vperm.xlu1 %1413, %v304_v17  }
  0x7b   : > { %489 = vperm.xlu1 %1413, %v305_v18  }
  0x7f   : > { %1415 = vset.pattern.permute.xlu1 %v1471_v4 }
  0x80   : > { %405 = vperm.xlu1 %1415, %v315_v20  }
  0x84   : > { %1417 = vset.pattern.permute.xlu1 %v1472_v8 }
  0x85   : > { %445 = vperm.xlu1 %1417, %v307_v12  }
  0x89   : > { %1418 = vset.pattern.permute.xlu1 %v1473_v15 }
  0x8a   : > { %537 = vperm.xlu1 %1418, %v304_v17  }
  0x8e   : > { %1419 = vset.pattern.permute.xlu1 %v1470_v3 }
  0x8f   : > { %493 = vperm.xlu1 %1419, %v306_v16  }
  0x93   : > { %497 = vperm.xlu1 %1419, %v307_v12  }
  0x97   : > { %1420 = vset.pattern.permute.xlu1 %v1473_v15 }
  0x98   : > { %549 = vperm.xlu1 %1420, %v307_v12  }
  0xa5   : > { %v371_v23 = vpop.permute.xlu1 %370  ;;  %v1687_v24 = vpop.permute.xlu0 %477 }
  0xa6   : > { %v506_v21 = vmul.f32 %v1705_v51, %v1687_v24 }
  0xa9   : > { %v376_v25 = vpop.permute.xlu1 %375 }
  0xaa   : > { %v319_v26 = vpop.permute.xlu0 %318 }
  0xab   : > { %v360_v45 = vmul.f32 %v1697_v40, %v319_v26 }
  0xad   : > { %v408_v52 = vadd.f32 %v371_v23, %v360_v45 }
  0xae   : > { %v422_v27 = vpop.permute.xlu1 %421  ;;  %v324_v28 = vpop.permute.xlu0 %323 }
  0xaf   : > { %v361_v53 = vmul.f32 %v1697_v40, %v324_v28  ;;  %v453_v0 = vmul.f32 %v1702_v46, %v422_v27 }
  0xb1   : > { %v409_v59 = vadd.f32 %v376_v25, %v361_v53 }
  0xb2   : > { %v1689_v29 = vpop.permute.xlu0 %333 }
  0xb3   : > { %v329_v30 = vpop.permute.xlu1 %328  ;;  %v461_v2 = vadd.f32 %v453_v0, %v409_v59  ;;  %v363_v22 = vmul.f32 %v1697_v40, %v1689_v29 }
  0xb4   : > { %v362_v16 = vmul.f32 %v1697_v40, %v329_v30 }
  0xb6   : > { %v381_v32 = vpop.permute.xlu0 %380 }
  0xb7   : > { %v410_v18 = vadd.f32 %v381_v32, %v362_v16 }
  0xb8   : > { %v470_v33 = vpop.permute.xlu1 %469 }
  0xb9   : > { %v504_v58 = vmul.f32 %v1705_v51, %v470_v33 }
  0xba   : > { %v1692_v35 = vpop.permute.xlu0 %395 }
  0xbc   : > { %v474_v36 = vpop.permute.xlu1 %473 }
  0xbd   : > { %v505_v1 = vmul.f32 %v1705_v51, %v474_v36 }
  0xbe   : > { %v1695_v39 = vpop.permute.xlu0 %353 }
  0xbf   : > { %v513_v6 = vadd.f32 %v505_v1, %v461_v2 }
  0xc1   : > { %v386_v41 = vpop.permute.xlu1 %385 }
  0xc2   : > { %v1699_v43 = vpop.permute.xlu0 %400  ;;  %v411_v28 = vadd.f32 %v386_v41, %v363_v22 }
  0xc6   : > { %v430_v47 = vpop.permute.xlu1 %429 }
  0xc7   : > { %v418_v48 = vpop.permute.xlu0 %417  ;;  %v455_v25 = vmul.f32 %v1702_v46, %v430_v47 }
  0xc8   : > { %v452_v50 = vmul.f32 %v1702_v46, %v418_v48 }
  0xc9   : > { %v463_v34 = vadd.f32 %v455_v25, %v411_v28 }
  0xca   : > { %v460_v54 = vadd.f32 %v452_v50, %v408_v52 }
  0xcb   : > { %v426_v55 = vpop.permute.xlu0 %425  ;;  %v522_v56 = vpop.permute.xlu1 %521 }
  0xcc   : > { %v512_v60 = vadd.f32 %v504_v58, %v460_v54  ;;  %v556_v61 = vmul.f32 %v1708_v57, %v522_v56  ;;  %v454_v17 = vmul.f32 %v1702_v46, %v426_v55 }
  0xce   : > { %v564_v3 = vadd.f32 %v556_v61, %v512_v60  ;;  %v462_v23 = vadd.f32 %v454_v17, %v410_v18  ;;  %v367_v18 = vmul.f32 %v1697_v40, %v1695_v39 }
  0xcf   : > { %v442_v62 = vpop.permute.xlu0 %441 }
  0xd0   : > { %v1712_v63 = vpop.permute.xlu1 %338  ;;  %v580_v8 = vmul.f32 0.2, %v564_v3  ;;  %vm572_vm2 = vcmp.gt.f32.partialorder %v564_v3, 0.0  ;;  %v514_v30 = vadd.f32 %v506_v21, %v462_v23  ;;  %v458_v45 = vmul.f32 %v1702_v46, %v442_v62 }
  0xd2   : > { %v588_v12 = vsel %vm572_vm2, %v564_v3, %v580_v8 }
  0xd4   : > { %v526_v4 = vpop.permute.xlu0 %525  ;;  %v344_v5 = vpop.permute.xlu1 %343 }
  0xd5   : > { %v557_v7 = vmul.f32 %v1708_v57, %v526_v4  ;;  %v365_v55 = vmul.f32 %v1697_v40, %v344_v5 }
  0xd7   : > { %v565_v9 = vadd.f32 %v557_v7, %v513_v6  ;;  %v413_v59 = vadd.f32 %v1692_v35, %v365_v55 }
  0xd8   : > { %v530_v20 = vpop.permute.xlu0 %529 }
  0xd9   : > { %vm573_vm3 = vcmp.gt.f32.partialorder %v565_v9, 0.0  ;;  %v581_v10 = vmul.f32 0.2, %v565_v9  ;;  %v482_v11 = vpop.permute.xlu1 %481  ;;  %v558_v26 = vmul.f32 %v1708_v57, %v530_v20 }
  0xda   : > { %v507_v33 = vmul.f32 %v1705_v51, %v482_v11 }
  0xdb   : > { %v589_v13 = vsel %vm573_vm3, %v565_v9, %v581_v10  ;;  %v566_v32 = vadd.f32 %v558_v26, %v514_v30 }
  0xdc   : > { %v612_v14 = vpack.c.bf16 %v589_v13, %v588_v12  ;;  %v515_v37 = vadd.f32 %v507_v33, %v463_v34  ;;  %v542_v61 = vpop.permute.xlu0 %541 }
  0xdd   : > { %v582_v24 = vmul.f32 0.2, %v566_v32  ;;  %vm574_vm4 = vcmp.gt.f32.partialorder %v566_v32, 0.0  ;;  %v561_v2 = vmul.f32 %v1708_v57, %v542_v61  ;;  %v786_v61 = vand.u32 (!%p1299_p8), 127, %v356_v31 }
  0xde   : > { %v391_v15 = vpop.permute.xlu1 %390  ;;  %1320 = vmatprep.subr.bf16.mxu0 %v612_v14  ;;  %1344 = vmatprep.subr.bf16.mxu1 %v612_v14 }
  0xdf   : > { %1321 = vmatpush3.bf16.msra.mxu0 %v612_v14  ;;  %1348 = vmatpush3.bf16.msra.mxu1 %v612_v14  ;;  %v590_v41 = vsel %vm574_vm4, %v566_v32, %v582_v24  ;;  %v1427_v24 = vld [vmem:[%s2099_s3 + $0x18] sm:$0xff]  }
  0xe0   : > { %v546_v17 = vpop.permute.xlu0 %545 }
  0xe1   : > { %v562_v23 = vmul.f32 %v1708_v57, %v546_v17 }
  0xe3   : > { %v434_v19 = vpop.permute.xlu1 %433 }
  0xe4   : > { %v456_v0 = vmul.f32 %v1702_v46, %v434_v19 }
  0xe7   : > { %v438_v27 = vpop.permute.xlu1 %437 }
  0xe8   : > { %v457_v56 = vmul.f32 %v1702_v46, %v438_v27 }
  0xea   : > { %v465_v62 = vadd.f32 %v457_v56, %v413_v59 }
  0xec   : > { %v534_v36 = vpop.permute.xlu1 %533 }
  0xed   : > { %v559_v38 = vmul.f32 %v1708_v57, %v534_v36 }
  0xef   : > { %v567_v42 = vadd.f32 %v559_v38, %v515_v37  ;;  %v1424_v37 = vld [vmem:[%s2099_s3 + $0x28] sm:$0xff]   ;;  %v1426_v38 = vld [vmem:[%s2099_s3 + $0x30] sm:$0xff]  }
  0xf1   : > { %vm575_vm5 = vcmp.gt.f32.partialorder %v567_v42, 0.0  ;;  %v583_v29 = vmul.f32 0.2, %v567_v42  ;;  %v349_v44 = vpop.permute.xlu1 %348 }
  0xf2   : > { %v366_v47 = vmul.f32 %v1697_v40, %v349_v44 }
  0xf3   : > { %v591_v48 = vsel %vm575_vm5, %v567_v42, %v583_v29  ;;  %v1428_v42 = vld [vmem:[%s2099_s3 + $0x38] sm:$0xff]  }
  0xf4   : > { %v414_v49 = vadd.f32 %v1699_v43, %v366_v47  ;;  %v613_v50 = vpack.c.bf16 %v591_v48, %v590_v41  ;;  %v364_v43 = vmul.f32 %v1697_v40, %v1712_v63 }
  0xf6   : > { %v486_v52 = vpop.permute.xlu1 %485  ;;  %1322 = vmatprep.subr.bf16.mxu0 %v613_v50  ;;  %1345 = vmatprep.subr.bf16.mxu1 %v613_v50  ;;  %v466_v53 = vadd.f32 %v458_v45, %v414_v49  ;;  %v412_v4 = vadd.f32 %v391_v15, %v364_v43 }
  0xf7   : > { %1323 = vmatpush3.bf16.msra.mxu0 %v613_v50  ;;  %1349 = vmatpush3.bf16.msra.mxu1 %v613_v50  ;;  %v508_v5 = vmul.f32 %v1705_v51, %v486_v52 }
  0xf8   : > { %v464_v6 = vadd.f32 %v456_v0, %v412_v4 }
  0xfa   : > { %v490_v54 = vpop.permute.xlu1 %489  ;;  %v516_v35 = vadd.f32 %v508_v5, %v464_v6 }
  0xfb   : > { %v509_v60 = vmul.f32 %v1705_v51, %v490_v54 }
  0xfd   : > { %v517_v1 = vadd.f32 %v509_v60, %v465_v62  ;;  %v787_v62 = vstv (!%p1299_p8), %s1306_s12 }
  0xfe   : > { %v788_v43 = vadd.s32 (!%p1299_p8), %v787_v62, %v786_v61  ;;  %v812_v61 = vld [vmem:[%s1541_s30 + $0x20] sm:$0xff] (!%p1299_p8) }
  0xff   : > { %v406_v58 = vpop.permute.xlu1 %405  ;;  %v569_v7 = vadd.f32 %v561_v2, %v517_v1 }
 0x100   : > { %v415_v22 = vadd.f32 %v406_v58, %v367_v18  ;;  %vm789_vm10 = vcmp.lt.s32.totalorder (!%p1299_p8), %v788_v43, 320 }
 0x101   : > { %v585_v10 = vmul.f32 0.2, %v569_v7  ;;  %vm577_vm6 = vcmp.gt.f32.partialorder %v569_v7, 0.0 }
 0x103   : > { %v593_v14 = vsel %vm577_vm6, %v569_v7, %v585_v10 }
 0x104   : > { %v446_v3 = vpop.permute.xlu1 %445 }
 0x105   : > { %v459_v19 = vmul.f32 %v1702_v46, %v446_v3 }
 0x107   : > { %v467_v26 = vadd.f32 %v459_v19, %v415_v22 }
 0x109   : > { %v538_v8 = vpop.permute.xlu1 %537 }
 0x10a   : > { %v560_v9 = vmul.f32 %v1708_v57, %v538_v8 }
 0x10c   : > { %v568_v11 = vadd.f32 %v560_v9, %v516_v35 }
 0x10e   : > { %vm576_vm7 = vcmp.gt.f32.partialorder %v568_v11, 0.0  ;;  %v584_v63 = vmul.f32 0.2, %v568_v11  ;;  %v494_v12 = vpop.permute.xlu1 %493 }
 0x10f   : > { %v510_v13 = vmul.f32 %v1705_v51, %v494_v12 }
 0x110   : > { %v592_v16 = vsel %vm576_vm7, %v568_v11, %v584_v63 }
 0x111   : > { %v614_v15 = vpack.c.bf16 %v593_v14, %v592_v16  ;;  %v518_v20 = vadd.f32 %v510_v13, %v466_v53 }
 0x112   : > { %v498_v21 = vpop.permute.xlu1 %497 }
 0x113   : > { %1324 = vmatprep.subr.bf16.mxu0 %v614_v15  ;;  %1346 = vmatprep.subr.bf16.mxu1 %v614_v15  ;;  %v511_v25 = vmul.f32 %v1705_v51, %v498_v21  ;;  %v570_v27 = vadd.f32 %v562_v23, %v518_v20  ;;  %v1423_v51 = vld [vmem:[%s2099_s3 + $0x8] sm:$0xff]  }
 0x114   : > { %1325 = vmatpush3.bf16.msra.mxu0 %v614_v15  ;;  %1350 = vmatpush3.bf16.msra.mxu1 %v614_v15 }
 0x115   : > { %v519_v30 = vadd.f32 %v511_v25, %v467_v26  ;;  %v586_v39 = vmul.f32 0.2, %v570_v27  ;;  %vm578_vm8 = vcmp.gt.f32.partialorder %v570_v27, 0.0 }
 0x117   : > { %v550_v28 = vpop.permute.xlu1 %549  ;;  %v594_v32 = vsel %vm578_vm8, %v570_v27, %v586_v39  ;;  %v808_v39 = vld [vmem:[%s1541_s30] sm:$0xff] (!%p1299_p8) }
 0x118   : > { %v563_v33 = vmul.f32 %v1708_v57, %v550_v28  ;;  %v1425_v57 = vld [vmem:[%s2099_s3 + $0x10] sm:$0xff]  }
 0x11a   : > { %v571_v40 = vadd.f32 %v563_v33, %v519_v30  ;;  %v810_v33 = vld [vmem:[%s1541_s30 + $0x10] sm:$0xff] (!%p1299_p8) }
 0x11c   : > { %vm579_vm9 = vcmp.gt.f32.partialorder %v571_v40, 0.0  ;;  %v587_v46 = vmul.f32 0.2, %v571_v40 }
 0x11e   : > { %v595_v34 = vsel %vm579_vm9, %v571_v40, %v587_v46 }
 0x11f   : > { %v615_v36 = vpack.c.bf16 %v595_v34, %v594_v32 }
 0x121   : > { %1326 = vmatprep.subr.bf16.mxu0 %v615_v36  ;;  %1347 = vmatprep.subr.bf16.mxu1 %v615_v36 }
 0x122   : > { %1327 = vmatpush3.bf16.msra.mxu0 %v615_v36  ;;  %1351 = vmatpush3.bf16.msra.mxu1 %v615_v36  ;;  %v811_v36 = vld [vmem:[%s1541_s30 + $0x18] sm:$0xff] (!%p1299_p8) }
 0x125   : > { %1329 = vmatmul.mubr.msk.bf16.vlgmr.msra.gmra.mrb[0].mxu0 %vm656_vm1, %v1423_v51  ;;  %1337 = vmatmul.mubr.msk.bf16.vlgmr.msra.gmra.mrb[0].mxu1 %vm656_vm1, %v1424_v37  ;;  %v809_v51 = vld [vmem:[%s1541_s30 + $0x8] sm:$0xff] (!%p1299_p8) }
 0x126   : > { %1332 = vmatprep.mubr.msk.bf16.mxu0 %vm656_vm1, %v1425_v57  ;;  %1340 = vmatprep.mubr.msk.bf16.mxu1 %vm656_vm1, %v1426_v38 }
 0x12d   : > { %1333 = vmatmul.mubr.msk.bf16.gmra.mrb[4].mxu0 %vm656_vm1, %v1427_v24  ;;  %1341 = vmatmul.mubr.msk.bf16.gmra.mrb[4].mxu1 %vm656_vm1, %v1428_v42  ;;  %v813_v42 = vld [vmem:[%s1541_s30 + $0x28] sm:$0xff] (!%p1299_p8) }
 0x1f8   : > { %v1774_v29 = vpop.f32.mrb[0].mxu0  ;;  %v1776_v44 = vpop.f32.mrb[0].mxu1 }
 0x1f9   : > { %v1778_v45 = vpop.f32.mrb[1].mxu0  ;;  %v1780_v47 = vpop.f32.mrb[1].mxu1  ;;  %v794_v0 = vsel (!%p1299_p8), %vm789_vm10, %v1774_v29, 0.0  ;;  %v802_v9 = vsel (!%p1299_p8), %vm789_vm10, %v1776_v44, 0.0 }
 0x1fa   : > { %v1782_v41 = vpop.f32.mrb[2].mxu0  ;;  %v1784_v48 = vpop.f32.mrb[2].mxu1  ;;  %v792_v1 = vsel (!%p1299_p8), %vm789_vm10, %v1778_v45, 0.0  ;;  %828 = vadd.xlane.f32.xlu1 (!%p1299_p8), %v794_v0  ;;  %v800_v8 = vsel (!%p1299_p8), %vm789_vm10, %v1780_v47, 0.0  ;;  %v907_v17 = vmul.f32 (!%p1299_p8), %v794_v0, %v794_v0  ;;  %v915_v25 = vmul.f32 (!%p1299_p8), %v802_v9, %v802_v9 }
 0x1fb   : > { %v1786_v49 = vpop.f32.mrb[3].mxu0  ;;  %v1788_v50 = vpop.f32.mrb[3].mxu1  ;;  %824 = vadd.xlane.f32.xlu0 (!%p1299_p8), %v792_v1  ;;  %v795_v2 = vsel (!%p1299_p8), %vm789_vm10, %v1782_v41, 0.0  ;;  %v803_v35 = vsel (!%p1299_p8), %vm789_vm10, %v1784_v48, 0.0  ;;  %v905_v14 = vmul.f32 (!%p1299_p8), %v792_v1, %v792_v1  ;;  %v913_v22 = vmul.f32 (!%p1299_p8), %v800_v8, %v800_v8 }
 0x1fc   : > { %v793_v3 = vsel (!%p1299_p8), %vm789_vm10, %v1786_v49, 0.0  ;;  %v801_v7 = vsel (!%p1299_p8), %vm789_vm10, %v1788_v50, 0.0  ;;  %v908_v16 = vmul.f32 (!%p1299_p8), %v795_v2, %v795_v2  ;;  %v916_v23 = vmul.f32 (!%p1299_p8), %v803_v35, %v803_v35 }
 0x1fd   : > { %783 = sbr.rel (%p1299_p8) target bundleno = 714 (0x2ca), region = 44  ;;  %v906_v13 = vmul.f32 (!%p1299_p8), %v793_v3, %v793_v3  ;;  %v914_v21 = vmul.f32 (!%p1299_p8), %v801_v7, %v801_v7 }
 0x1fe   : > { %830 = vadd.xlane.f32.xlu1 (!%p1299_p8), %v795_v2  ;;  %v815_v2 = vld [vmem:[%s1541_s30 + $0x38] sm:$0xff] (!%p1299_p8) }
 0x1ff   : > { %826 = vadd.xlane.f32.xlu0 (!%p1299_p8), %v793_v3  ;;  %v814_v3 = vld [vmem:[%s1541_s30 + $0x30] sm:$0xff] (!%p1299_p8) }
 0x200   : > { %v1790_v52 = vpop.f32.mrb[4].mxu0  ;;  %v1792_v53 = vpop.f32.mrb[4].mxu1 }
 0x201   : > { %v1794_v54 = vpop.f32.mrb[5].mxu0  ;;  %v1796_v55 = vpop.f32.mrb[5].mxu1  ;;  %v798_v6 = vsel (!%p1299_p8), %vm789_vm10, %v1790_v52, 0.0  ;;  %v806_v12 = vsel (!%p1299_p8), %vm789_vm10, %v1792_v53, 0.0 }
 0x202   : > { %v1798_v56 = vpop.f32.mrb[6].mxu0  ;;  %v1800_v58 = vpop.f32.mrb[6].mxu1  ;;  %v796_v4 = vsel (!%p1299_p8), %vm789_vm10, %v1794_v54, 0.0  ;;  %v804_v11 = vsel (!%p1299_p8), %vm789_vm10, %v1796_v55, 0.0  ;;  %v911_v20 = vmul.f32 (!%p1299_p8), %v798_v6, %v798_v6  ;;  %v919_v30 = vmul.f32 (!%p1299_p8), %v806_v12, %v806_v12 }
 0x203   : > { %v1802_v59 = vpop.f32.mrb[7].mxu0  ;;  %v1804_v60 = vpop.f32.mrb[7].mxu1  ;;  %832 = vadd.xlane.f32.xlu0 (!%p1299_p8), %v796_v4  ;;  %v799_v5 = vsel (!%p1299_p8), %vm789_vm10, %v1798_v56, 0.0  ;;  %v807_v63 = vsel (!%p1299_p8), %vm789_vm10, %v1800_v58, 0.0  ;;  %v909_v18 = vmul.f32 (!%p1299_p8), %v796_v4, %v796_v4  ;;  %v917_v27 = vmul.f32 (!%p1299_p8), %v804_v11, %v804_v11 }
 0x204   : > { %v797_v31 = vsel %vm789_vm10, %v1802_v59, 0.0  ;;  %v805_v10 = vsel %vm789_vm10, %v1804_v60, 0.0  ;;  %v912_v19 = vmul.f32 %v799_v5, %v799_v5  ;;  %v920_v28 = vmul.f32 %v807_v63, %v807_v63 }
 0x205   : > { %834 = vadd.xlane.f32.xlu1 %v797_v31  ;;  %v910_v15 = vmul.f32 %v797_v31, %v797_v31  ;;  %v918_v26 = vmul.f32 %v805_v10, %v805_v10 }
 0x207   : > { %836 = vadd.xlane.f32.xlu0 %v798_v6 }
 0x209   : > { %838 = vadd.xlane.f32.xlu1 %v799_v5 }
 0x20b   : > { %840 = vadd.xlane.f32.xlu0 %v800_v8  ;;  %v816_v8 = vld [vmem:[%s1541_s30 + $0x40] sm:$0xff] }
 0x20d   : > { %842 = vadd.xlane.f32.xlu1 %v801_v7  ;;  %v817_v7 = vld [vmem:[%s1541_s30 + $0x48] sm:$0xff] }
 0x20f   : > { %844 = vadd.xlane.f32.xlu0 %v802_v9 }
 0x211   : > { %846 = vadd.xlane.f32.xlu1 %v803_v35 }
 0x213   : > { %848 = vadd.xlane.f32.xlu0 %v804_v11 }
 0x215   : > { %850 = vadd.xlane.f32.xlu1 %v805_v10 }
 0x217   : > { %852 = vadd.xlane.f32.xlu0 %v806_v12  ;;  %v818_v12 = vld [vmem:[%s1541_s30 + $0x50] sm:$0xff] }
 0x219   : > { %854 = vadd.xlane.f32.xlu1 %v807_v63  ;;  %v819_v63 = vld [vmem:[%s1541_s30 + $0x58] sm:$0xff] }
 0x21b   : > { %921 = vadd.xlane.f32.xlu0 %v905_v14 }
 0x21d   : > { %923 = vadd.xlane.f32.xlu1 %v906_v13 }
 0x21f   : > { %925 = vadd.xlane.f32.xlu0 %v907_v17 }
 0x221   : > { %927 = vadd.xlane.f32.xlu1 %v908_v16 }
 0x223   : > { %929 = vadd.xlane.f32.xlu0 %v909_v18  ;;  %v820_v18 = vld [vmem:[%s1541_s30 + $0x60] sm:$0xff] }
 0x225   : > { %931 = vadd.xlane.f32.xlu1 %v910_v15  ;;  %v821_v15 = vld [vmem:[%s1541_s30 + $0x68] sm:$0xff] }
 0x227   : > { %933 = vadd.xlane.f32.xlu0 %v911_v20 }
 0x229   : > { %935 = vadd.xlane.f32.xlu1 %v912_v19 }
 0x22b   : > { %937 = vadd.xlane.f32.xlu0 %v913_v22 }
 0x22d   : > { %939 = vadd.xlane.f32.xlu1 %v914_v21 }
 0x22f   : > { %941 = vadd.xlane.f32.xlu0 %v915_v25  ;;  %v822_v25 = vld [vmem:[%s1541_s30 + $0x70] sm:$0xff] }
 0x231   : > { %943 = vadd.xlane.f32.xlu1 %v916_v23  ;;  %v823_v23 = vld [vmem:[%s1541_s30 + $0x78] sm:$0xff] }
 0x233   : > { %945 = vadd.xlane.f32.xlu0 %v917_v27 }
 0x235   : > { %947 = vadd.xlane.f32.xlu1 %v918_v26 }
 0x237   : > { %949 = vadd.xlane.f32.xlu0 %v919_v30 }
 0x239   : > { %951 = vadd.xlane.f32.xlu1 %v920_v28 }
 0x287   : > { %v829_v40 = vpop.xlane.xlu1 %828 }
 0x288   : > { %v825_v46 = vpop.xlane.xlu0 %824  ;;  %v858_v34 = vadd.f32 %v829_v40, %v810_v33  ;;  %v890_v33 = vld [vmem:[%s1546_s8 + $0x8] sm:$0xff] }
 0x289   : > { %v856_v32 = vadd.f32 %v825_v46, %v808_v39  ;;  %v889_v39 = vld [vmem:[%s1546_s8] sm:$0xff] }
 0x28a   : > { %875 = vst.msk [vmem:[%s1541_s30 + $0x10] sm:$0xff] %vm872_vm11, %v858_v34 }
 0x28b   : > { %873 = vst.msk [vmem:[%s1541_s30] sm:$0xff] %vm872_vm11, %v856_v32  ;;  %v831_v37 = vpop.xlane.xlu1 %830 }
 0x28c   : > { %v827_v57 = vpop.xlane.xlu0 %826  ;;  %v859_v38 = vadd.f32 %v831_v37, %v811_v36  ;;  %v892_v36 = vld [vmem:[%s1546_s8 + $0x18] sm:$0xff] }
 0x28d   : > { %v857_v24 = vadd.f32 %v827_v57, %v809_v51  ;;  %v891_v51 = vld [vmem:[%s1546_s8 + $0x10] sm:$0xff] }
 0x28e   : > { %876 = vst.msk [vmem:[%s1541_s30 + $0x18] sm:$0xff] %vm872_vm11, %v859_v38 }
 0x28f   : > { %874 = vst.msk [vmem:[%s1541_s30 + $0x8] sm:$0xff] %vm872_vm11, %v857_v24 }
 0x290   : > { %v833_v43 = vpop.xlane.xlu0 %832 }
 0x291   : > { %v860_v1 = vadd.f32 %v833_v43, %v812_v61  ;;  %v893_v61 = vld [vmem:[%s1546_s8 + $0x20] sm:$0xff] }
 0x292   : > { %v835_v62 = vpop.xlane.xlu1 %834 }
 0x293   : > { %v861_v0 = vadd.f32 %v835_v62, %v813_v42  ;;  %877 = vst.msk [vmem:[%s1541_s30 + $0x20] sm:$0xff] %vm872_vm11, %v860_v1  ;;  %v894_v42 = vld [vmem:[%s1546_s8 + $0x28] sm:$0xff] }
 0x294   : > { %v837_v4 = vpop.xlane.xlu0 %836 }
 0x295   : > { %878 = vst.msk [vmem:[%s1541_s30 + $0x28] sm:$0xff] %vm872_vm11, %v861_v0  ;;  %v862_v6 = vadd.f32 %v837_v4, %v814_v3  ;;  %v895_v3 = vld [vmem:[%s1546_s8 + $0x30] sm:$0xff] }
 0x296   : > { %v839_v31 = vpop.xlane.xlu1 %838 }
 0x297   : > { %v863_v5 = vadd.f32 %v839_v31, %v815_v2  ;;  %879 = vst.msk [vmem:[%s1541_s30 + $0x30] sm:$0xff] %vm872_vm11, %v862_v6  ;;  %v896_v2 = vld [vmem:[%s1546_s8 + $0x38] sm:$0xff] }
 0x298   : > { %v841_v9 = vpop.xlane.xlu0 %840 }
 0x299   : > { %880 = vst.msk [vmem:[%s1541_s30 + $0x38] sm:$0xff] %vm872_vm11, %v863_v5  ;;  %v864_v11 = vadd.f32 %v841_v9, %v816_v8  ;;  %v897_v8 = vld [vmem:[%s1546_s8 + $0x40] sm:$0xff] }
 0x29a   : > { %v843_v35 = vpop.xlane.xlu1 %842 }
 0x29b   : > { %v865_v10 = vadd.f32 %v843_v35, %v817_v7  ;;  %881 = vst.msk [vmem:[%s1541_s30 + $0x40] sm:$0xff] %vm872_vm11, %v864_v11  ;;  %v898_v7 = vld [vmem:[%s1546_s8 + $0x48] sm:$0xff] }
 0x29c   : > { %v845_v14 = vpop.xlane.xlu0 %844 }
 0x29d   : > { %882 = vst.msk [vmem:[%s1541_s30 + $0x48] sm:$0xff] %vm872_vm11, %v865_v10  ;;  %v866_v17 = vadd.f32 %v845_v14, %v818_v12  ;;  %v899_v12 = vld [vmem:[%s1546_s8 + $0x50] sm:$0xff] }
 0x29e   : > { %v847_v13 = vpop.xlane.xlu1 %846 }
 0x29f   : > { %v867_v16 = vadd.f32 %v847_v13, %v819_v63  ;;  %883 = vst.msk [vmem:[%s1541_s30 + $0x50] sm:$0xff] %vm872_vm11, %v866_v17  ;;  %v900_v63 = vld [vmem:[%s1546_s8 + $0x58] sm:$0xff] }
 0x2a0   : > { %v849_v20 = vpop.xlane.xlu0 %848 }
 0x2a1   : > { %884 = vst.msk [vmem:[%s1541_s30 + $0x58] sm:$0xff] %vm872_vm11, %v867_v16  ;;  %v868_v22 = vadd.f32 %v849_v20, %v820_v18  ;;  %v901_v18 = vld [vmem:[%s1546_s8 + $0x60] sm:$0xff] }
 0x2a2   : > { %v851_v19 = vpop.xlane.xlu1 %850 }
 0x2a3   : > { %v869_v21 = vadd.f32 %v851_v19, %v821_v15  ;;  %885 = vst.msk [vmem:[%s1541_s30 + $0x60] sm:$0xff] %vm872_vm11, %v868_v22  ;;  %v902_v15 = vld [vmem:[%s1546_s8 + $0x68] sm:$0xff] }
 0x2a4   : > { %v853_v27 = vpop.xlane.xlu0 %852 }
 0x2a5   : > { %886 = vst.msk [vmem:[%s1541_s30 + $0x68] sm:$0xff] %vm872_vm11, %v869_v21  ;;  %v870_v30 = vadd.f32 %v853_v27, %v822_v25  ;;  %v903_v25 = vld [vmem:[%s1546_s8 + $0x70] sm:$0xff] }
 0x2a6   : > { %v855_v26 = vpop.xlane.xlu1 %854 }
 0x2a7   : > { %v871_v28 = vadd.f32 %v855_v26, %v823_v23  ;;  %887 = vst.msk [vmem:[%s1541_s30 + $0x70] sm:$0xff] %vm872_vm11, %v870_v30  ;;  %v904_v23 = vld [vmem:[%s1546_s8 + $0x78] sm:$0xff] }
 0x2a8   : > { %v922_v46 = vpop.xlane.xlu0 %921 }
 0x2a9   : > { %888 = vst.msk [vmem:[%s1541_s30 + $0x78] sm:$0xff] %vm872_vm11, %v871_v28  ;;  %v953_v32 = vadd.f32 %v922_v46, %v889_v39 }
 0x2aa   : > { %v924_v40 = vpop.xlane.xlu1 %923 }
 0x2ab   : > { %v954_v34 = vadd.f32 %v924_v40, %v890_v33  ;;  %969 = vst.msk [vmem:[%s1546_s8] sm:$0xff] %vm872_vm11, %v953_v32 }
 0x2ac   : > { %v926_v57 = vpop.xlane.xlu0 %925 }
 0x2ad   : > { %970 = vst.msk [vmem:[%s1546_s8 + $0x8] sm:$0xff] %vm872_vm11, %v954_v34  ;;  %v955_v24 = vadd.f32 %v926_v57, %v891_v51 }
 0x2ae   : > { %v928_v37 = vpop.xlane.xlu1 %927 }
 0x2af   : > { %v956_v38 = vadd.f32 %v928_v37, %v892_v36  ;;  %971 = vst.msk [vmem:[%s1546_s8 + $0x10] sm:$0xff] %vm872_vm11, %v955_v24 }
 0x2b0   : > { %v930_v43 = vpop.xlane.xlu0 %929 }
 0x2b1   : > { %972 = vst.msk [vmem:[%s1546_s8 + $0x18] sm:$0xff] %vm872_vm11, %v956_v38  ;;  %v957_v1 = vadd.f32 %v930_v43, %v893_v61 }
 0x2b2   : > { %v932_v62 = vpop.xlane.xlu1 %931 }
 0x2b3   : > { %v958_v0 = vadd.f32 %v932_v62, %v894_v42  ;;  %973 = vst.msk [vmem:[%s1546_s8 + $0x20] sm:$0xff] %vm872_vm11, %v957_v1 }
 0x2b4   : > { %v934_v4 = vpop.xlane.xlu0 %933 }
 0x2b5   : > { %974 = vst.msk [vmem:[%s1546_s8 + $0x28] sm:$0xff] %vm872_vm11, %v958_v0  ;;  %v959_v6 = vadd.f32 %v934_v4, %v895_v3 }
 0x2b6   : > { %v936_v31 = vpop.xlane.xlu1 %935 }
 0x2b7   : > { %v960_v5 = vadd.f32 %v936_v31, %v896_v2  ;;  %975 = vst.msk [vmem:[%s1546_s8 + $0x30] sm:$0xff] %vm872_vm11, %v959_v6 }
 0x2b8   : > { %v938_v9 = vpop.xlane.xlu0 %937 }
 0x2b9   : > { %976 = vst.msk [vmem:[%s1546_s8 + $0x38] sm:$0xff] %vm872_vm11, %v960_v5  ;;  %v961_v11 = vadd.f32 %v938_v9, %v897_v8 }
 0x2ba   : > { %v940_v35 = vpop.xlane.xlu1 %939 }
 0x2bb   : > { %v962_v10 = vadd.f32 %v940_v35, %v898_v7  ;;  %977 = vst.msk [vmem:[%s1546_s8 + $0x40] sm:$0xff] %vm872_vm11, %v961_v11 }
 0x2bc   : > { %v942_v14 = vpop.xlane.xlu0 %941 }
 0x2bd   : > { %978 = vst.msk [vmem:[%s1546_s8 + $0x48] sm:$0xff] %vm872_vm11, %v962_v10  ;;  %v963_v17 = vadd.f32 %v942_v14, %v899_v12 }
 0x2be   : > { %v944_v13 = vpop.xlane.xlu1 %943 }
 0x2bf   : > { %v964_v16 = vadd.f32 %v944_v13, %v900_v63  ;;  %979 = vst.msk [vmem:[%s1546_s8 + $0x50] sm:$0xff] %vm872_vm11, %v963_v17 }
 0x2c0   : > { %v946_v20 = vpop.xlane.xlu0 %945 }
 0x2c1   : > { %980 = vst.msk [vmem:[%s1546_s8 + $0x58] sm:$0xff] %vm872_vm11, %v964_v16  ;;  %v965_v22 = vadd.f32 %v946_v20, %v901_v18 }
 0x2c2   : > { %v948_v19 = vpop.xlane.xlu1 %947 }
 0x2c3   : > { %v966_v21 = vadd.f32 %v948_v19, %v902_v15  ;;  %981 = vst.msk [vmem:[%s1546_s8 + $0x60] sm:$0xff] %vm872_vm11, %v965_v22 }
 0x2c4   : > { %v950_v27 = vpop.xlane.xlu0 %949 }
 0x2c5   : > { %982 = vst.msk [vmem:[%s1546_s8 + $0x68] sm:$0xff] %vm872_vm11, %v966_v21  ;;  %v967_v30 = vadd.f32 %v950_v27, %v903_v25 }
 0x2c6   : > { %v952_v26 = vpop.xlane.xlu1 %951 }
 0x2c7   : > { %v968_v28 = vadd.f32 %v952_v26, %v904_v23  ;;  %983 = vst.msk [vmem:[%s1546_s8 + $0x70] sm:$0xff] %vm872_vm11, %v967_v30 }
 0x2c9   : > { %984 = vst.msk [vmem:[%s1546_s8 + $0x78] sm:$0xff] %vm872_vm11, %v968_v28 }
 0x2ca PF: > { %p1301_p9 = scmp.gt.s32.totalorder %s1772_s14, 320 }
 0x2cb   : > { %1009 = vadd.xlane.f32.xlu1 (!%p1301_p9), %v1774_v29  ;;  %1005 = vadd.xlane.f32.xlu0 (!%p1301_p9), %v1778_v45  ;;  %v1087_v33 = vmul.f32 (!%p1301_p9), %v1786_v49, %v1786_v49  ;;  %v1086_v39 = vmul.f32 (!%p1301_p9), %v1778_v45, %v1778_v45  ;;  %v1089_v40 = vmul.f32 (!%p1301_p9), %v1782_v41, %v1782_v41  ;;  %vm1053_vm12 = vcmask (!%p1301_p9), 7168   ;;  %v992_v37 = vld [vmem:[%s1541_s30 + $0x18] sm:$0xff] (!%p1301_p9)  ;;  %v990_v57 = vld [vmem:[%s1541_s30 + $0x8] sm:$0xff] (!%p1301_p9)  ;;  %v993_v61 = vld [vmem:[%s1541_s30 + $0x20] sm:$0xff] (!%p1301_p9) }
 0x2cc   : > { %988 = sbr.rel (%p1301_p9) target bundleno = 920 (0x398), region = 48  ;;  %v1088_v46 = vmul.f32 (!%p1301_p9), %v1774_v29, %v1774_v29  ;;  %v1091_v34 = vmul.f32 (!%p1301_p9), %v1802_v59, %v1802_v59  ;;  %v1090_v32 = vmul.f32 (!%p1301_p9), %v1794_v54, %v1794_v54  ;;  %v1093_v45 = vmul.f32 (!%p1301_p9), %v1798_v56, %v1798_v56  ;;  %v994_v42 = vld [vmem:[%s1541_s30 + $0x28] sm:$0xff] (!%p1301_p9)  ;;  %v996_v2 = vld [vmem:[%s1541_s30 + $0x38] sm:$0xff] (!%p1301_p9)  ;;  %v995_v3 = vld [vmem:[%s1541_s30 + $0x30] sm:$0xff] (!%p1301_p9) }
 0x2cd   : > { %v1095_v29 = vmul.f32 (!%p1301_p9), %v1788_v50, %v1788_v50  ;;  %v998_v7 = vld [vmem:[%s1541_s30 + $0x48] sm:$0xff] (!%p1301_p9)  ;;  %v997_v8 = vld [vmem:[%s1541_s30 + $0x40] sm:$0xff] (!%p1301_p9)  ;;  %v1000_v63 = vld [vmem:[%s1541_s30 + $0x58] sm:$0xff] (!%p1301_p9) }
 0x2ce   : > { %v999_v12 = vld [vmem:[%s1541_s30 + $0x50] sm:$0xff] (!%p1301_p9)  ;;  %v1002_v15 = vld [vmem:[%s1541_s30 + $0x68] sm:$0xff] (!%p1301_p9)  ;;  %v1001_v18 = vld [vmem:[%s1541_s30 + $0x60] sm:$0xff] (!%p1301_p9) }
 0x2cf   : > { %1011 = vadd.xlane.f32.xlu1 (!%p1301_p9), %v1782_v41  ;;  %1007 = vadd.xlane.f32.xlu0 (!%p1301_p9), %v1786_v49  ;;  %v1092_v49 = vmul.f32 (!%p1301_p9), %v1790_v52, %v1790_v52  ;;  %v1094_v41 = vmul.f32 (!%p1301_p9), %v1780_v47, %v1780_v47  ;;  %v1004_v23 = vld [vmem:[%s1541_s30 + $0x78] sm:$0xff] (!%p1301_p9)  ;;  %v1003_v25 = vld [vmem:[%s1541_s30 + $0x70] sm:$0xff] (!%p1301_p9) }
 0x2d3   : > { %1015 = vadd.xlane.f32.xlu1 %v1802_v59  ;;  %1013 = vadd.xlane.f32.xlu0 %v1794_v54  ;;  %v1097_v54 = vmul.f32 %v1784_v48, %v1784_v48  ;;  %v989_v59 = vld [vmem:[%s1541_s30] sm:$0xff] }
 0x2d7   : > { %1019 = vadd.xlane.f32.xlu1 %v1798_v56  ;;  %1017 = vadd.xlane.f32.xlu0 %v1790_v52  ;;  %v1096_v56 = vmul.f32 %v1776_v44, %v1776_v44  ;;  %v1099_v52 = vmul.f32 %v1804_v60, %v1804_v60 }
 0x2db   : > { %1023 = vadd.xlane.f32.xlu1 %v1788_v50  ;;  %1021 = vadd.xlane.f32.xlu0 %v1780_v47  ;;  %v1098_v50 = vmul.f32 %v1796_v55, %v1796_v55  ;;  %v1101_v47 = vmul.f32 %v1800_v58, %v1800_v58 }
 0x2df   : > { %1027 = vadd.xlane.f32.xlu1 %v1784_v48  ;;  %1025 = vadd.xlane.f32.xlu0 %v1776_v44  ;;  %v1100_v44 = vmul.f32 %v1792_v53, %v1792_v53  ;;  %v991_v48 = vld [vmem:[%s1541_s30 + $0x10] sm:$0xff] }
 0x2e3   : > { %1031 = vadd.xlane.f32.xlu1 %v1804_v60  ;;  %1029 = vadd.xlane.f32.xlu0 %v1796_v55 }
 0x2e7   : > { %1035 = vadd.xlane.f32.xlu1 %v1800_v58  ;;  %1033 = vadd.xlane.f32.xlu0 %v1792_v53 }
 0x2eb   : > { %1104 = vadd.xlane.f32.xlu1 %v1087_v33  ;;  %1102 = vadd.xlane.f32.xlu0 %v1086_v39  ;;  %v1071_v33 = vld [vmem:[%s1546_s8 + $0x8] sm:$0xff]  ;;  %v1070_v39 = vld [vmem:[%s1546_s8] sm:$0xff] }
 0x2ef   : > { %1108 = vadd.xlane.f32.xlu1 %v1089_v40  ;;  %1106 = vadd.xlane.f32.xlu0 %v1088_v46 }
 0x2f3   : > { %1112 = vadd.xlane.f32.xlu1 %v1091_v34  ;;  %1110 = vadd.xlane.f32.xlu0 %v1090_v32 }
 0x2f7   : > { %1116 = vadd.xlane.f32.xlu1 %v1093_v45  ;;  %1114 = vadd.xlane.f32.xlu0 %v1092_v49  ;;  %v1073_v45 = vld [vmem:[%s1546_s8 + $0x18] sm:$0xff]  ;;  %v1072_v49 = vld [vmem:[%s1546_s8 + $0x10] sm:$0xff] }
 0x2fb   : > { %1120 = vadd.xlane.f32.xlu1 %v1095_v29  ;;  %1118 = vadd.xlane.f32.xlu0 %v1094_v41 }
 0x2ff   : > { %1124 = vadd.xlane.f32.xlu1 %v1097_v54  ;;  %1122 = vadd.xlane.f32.xlu0 %v1096_v56 }
 0x303   : > { %1128 = vadd.xlane.f32.xlu1 %v1099_v52  ;;  %1126 = vadd.xlane.f32.xlu0 %v1098_v50  ;;  %v1075_v52 = vld [vmem:[%s1546_s8 + $0x28] sm:$0xff]  ;;  %v1074_v50 = vld [vmem:[%s1546_s8 + $0x20] sm:$0xff] }
 0x307   : > { %1132 = vadd.xlane.f32.xlu1 %v1101_v47  ;;  %1130 = vadd.xlane.f32.xlu0 %v1100_v44 }
 0x358   : > { %v1010_v60 = vpop.xlane.xlu1 %1009  ;;  %v1006_v55 = vpop.xlane.xlu0 %1005 }
 0x359   : > { %v1039_v36 = vadd.f32 %v1010_v60, %v991_v48  ;;  %v1037_v51 = vadd.f32 %v1006_v55, %v989_v59  ;;  %v1077_v60 = vld [vmem:[%s1546_s8 + $0x38] sm:$0xff]  ;;  %v1076_v55 = vld [vmem:[%s1546_s8 + $0x30] sm:$0xff] }
 0x35b   : > { %1056 = vst.msk [vmem:[%s1541_s30 + $0x10] sm:$0xff] %vm1053_vm12, %v1039_v36  ;;  %1054 = vst.msk [vmem:[%s1541_s30] sm:$0xff] %vm1053_vm12, %v1037_v51 }
 0x35c   : > { %v1012_v53 = vpop.xlane.xlu1 %1011  ;;  %v1008_v58 = vpop.xlane.xlu0 %1007 }
 0x35d   : > { %v1040_v38 = vadd.f32 %v1012_v53, %v992_v37  ;;  %v1038_v24 = vadd.f32 %v1008_v58, %v990_v57  ;;  %v1079_v53 = vld [vmem:[%s1546_s8 + $0x48] sm:$0xff]  ;;  %v1078_v58 = vld [vmem:[%s1546_s8 + $0x40] sm:$0xff] }
 0x35f   : > { %1057 = vst.msk [vmem:[%s1541_s30 + $0x18] sm:$0xff] %vm1053_vm12, %v1040_v38  ;;  %1055 = vst.msk [vmem:[%s1541_s30 + $0x8] sm:$0xff] %vm1053_vm12, %v1038_v24 }
 0x360   : > { %v1016_v62 = vpop.xlane.xlu1 %1015  ;;  %v1014_v43 = vpop.xlane.xlu0 %1013 }
 0x361   : > { %v1042_v0 = vadd.f32 %v1016_v62, %v994_v42  ;;  %v1041_v1 = vadd.f32 %v1014_v43, %v993_v61  ;;  %v1081_v62 = vld [vmem:[%s1546_s8 + $0x58] sm:$0xff]  ;;  %v1080_v43 = vld [vmem:[%s1546_s8 + $0x50] sm:$0xff] }
 0x363   : > { %1059 = vst.msk [vmem:[%s1541_s30 + $0x28] sm:$0xff] %vm1053_vm12, %v1042_v0  ;;  %1058 = vst.msk [vmem:[%s1541_s30 + $0x20] sm:$0xff] %vm1053_vm12, %v1041_v1 }
 0x364   : > { %v1020_v31 = vpop.xlane.xlu1 %1019  ;;  %v1018_v4 = vpop.xlane.xlu0 %1017 }
 0x365   : > { %v1044_v5 = vadd.f32 %v1020_v31, %v996_v2  ;;  %v1043_v6 = vadd.f32 %v1018_v4, %v995_v3  ;;  %v1083_v31 = vld [vmem:[%s1546_s8 + $0x68] sm:$0xff]  ;;  %v1082_v4 = vld [vmem:[%s1546_s8 + $0x60] sm:$0xff] }
 0x367   : > { %1061 = vst.msk [vmem:[%s1541_s30 + $0x38] sm:$0xff] %vm1053_vm12, %v1044_v5  ;;  %1060 = vst.msk [vmem:[%s1541_s30 + $0x30] sm:$0xff] %vm1053_vm12, %v1043_v6 }
 0x368   : > { %v1024_v35 = vpop.xlane.xlu1 %1023  ;;  %v1022_v9 = vpop.xlane.xlu0 %1021 }
 0x369   : > { %v1046_v10 = vadd.f32 %v1024_v35, %v998_v7  ;;  %v1045_v11 = vadd.f32 %v1022_v9, %v997_v8  ;;  %v1085_v35 = vld [vmem:[%s1546_s8 + $0x78] sm:$0xff]  ;;  %v1084_v9 = vld [vmem:[%s1546_s8 + $0x70] sm:$0xff] }
 0x36b   : > { %1063 = vst.msk [vmem:[%s1541_s30 + $0x48] sm:$0xff] %vm1053_vm12, %v1046_v10  ;;  %1062 = vst.msk [vmem:[%s1541_s30 + $0x40] sm:$0xff] %vm1053_vm12, %v1045_v11 }
 0x36c   : > { %v1028_v13 = vpop.xlane.xlu1 %1027  ;;  %v1026_v14 = vpop.xlane.xlu0 %1025 }
 0x36d   : > { %v1048_v16 = vadd.f32 %v1028_v13, %v1000_v63  ;;  %v1047_v17 = vadd.f32 %v1026_v14, %v999_v12 }
 0x36f   : > { %1065 = vst.msk [vmem:[%s1541_s30 + $0x58] sm:$0xff] %vm1053_vm12, %v1048_v16  ;;  %1064 = vst.msk [vmem:[%s1541_s30 + $0x50] sm:$0xff] %vm1053_vm12, %v1047_v17 }
 0x370   : > { %v1032_v19 = vpop.xlane.xlu1 %1031  ;;  %v1030_v20 = vpop.xlane.xlu0 %1029 }
 0x371   : > { %v1050_v21 = vadd.f32 %v1032_v19, %v1002_v15  ;;  %v1049_v22 = vadd.f32 %v1030_v20, %v1001_v18 }
 0x373   : > { %1067 = vst.msk [vmem:[%s1541_s30 + $0x68] sm:$0xff] %vm1053_vm12, %v1050_v21  ;;  %1066 = vst.msk [vmem:[%s1541_s30 + $0x60] sm:$0xff] %vm1053_vm12, %v1049_v22 }
 0x374   : > { %v1036_v26 = vpop.xlane.xlu1 %1035  ;;  %v1034_v27 = vpop.xlane.xlu0 %1033 }
 0x375   : > { %v1052_v28 = vadd.f32 %v1036_v26, %v1004_v23  ;;  %v1051_v30 = vadd.f32 %v1034_v27, %v1003_v25 }
 0x377   : > { %1069 = vst.msk [vmem:[%s1541_s30 + $0x78] sm:$0xff] %vm1053_vm12, %v1052_v28  ;;  %1068 = vst.msk [vmem:[%s1541_s30 + $0x70] sm:$0xff] %vm1053_vm12, %v1051_v30 }
 0x378   : > { %v1105_v40 = vpop.xlane.xlu1 %1104  ;;  %v1103_v46 = vpop.xlane.xlu0 %1102 }
 0x379   : > { %v1135_v34 = vadd.f32 %v1105_v40, %v1071_v33  ;;  %v1134_v32 = vadd.f32 %v1103_v46, %v1070_v39 }
 0x37b   : > { %1151 = vst.msk [vmem:[%s1546_s8 + $0x8] sm:$0xff] %vm1053_vm12, %v1135_v34  ;;  %1150 = vst.msk [vmem:[%s1546_s8] sm:$0xff] %vm1053_vm12, %v1134_v32 }
 0x37c   : > { %v1109_v29 = vpop.xlane.xlu1 %1108  ;;  %v1107_v41 = vpop.xlane.xlu0 %1106 }
 0x37d   : > { %v1137_v54 = vadd.f32 %v1109_v29, %v1073_v45  ;;  %v1136_v56 = vadd.f32 %v1107_v41, %v1072_v49 }
 0x37f   : > { %1153 = vst.msk [vmem:[%s1546_s8 + $0x18] sm:$0xff] %vm1053_vm12, %v1137_v54  ;;  %1152 = vst.msk [vmem:[%s1546_s8 + $0x10] sm:$0xff] %vm1053_vm12, %v1136_v56 }
 0x380   : > { %v1113_v47 = vpop.xlane.xlu1 %1112  ;;  %v1111_v44 = vpop.xlane.xlu0 %1110 }
 0x381   : > { %v1139_v48 = vadd.f32 %v1113_v47, %v1075_v52  ;;  %v1138_v59 = vadd.f32 %v1111_v44, %v1074_v50 }
 0x383   : > { %1155 = vst.msk [vmem:[%s1546_s8 + $0x28] sm:$0xff] %vm1053_vm12, %v1139_v48  ;;  %1154 = vst.msk [vmem:[%s1546_s8 + $0x20] sm:$0xff] %vm1053_vm12, %v1138_v59 }
 0x384   : > { %v1117_v36 = vpop.xlane.xlu1 %1116  ;;  %v1115_v51 = vpop.xlane.xlu0 %1114 }
 0x385   : > { %v1141_v37 = vadd.f32 %v1117_v36, %v1077_v60  ;;  %v1140_v57 = vadd.f32 %v1115_v51, %v1076_v55 }
 0x387   : > { %1157 = vst.msk [vmem:[%s1546_s8 + $0x38] sm:$0xff] %vm1053_vm12, %v1141_v37  ;;  %1156 = vst.msk [vmem:[%s1546_s8 + $0x30] sm:$0xff] %vm1053_vm12, %v1140_v57 }
 0x388   : > { %v1121_v38 = vpop.xlane.xlu1 %1120  ;;  %v1119_v24 = vpop.xlane.xlu0 %1118 }
 0x389   : > { %v1143_v42 = vadd.f32 %v1121_v38, %v1079_v53  ;;  %v1142_v61 = vadd.f32 %v1119_v24, %v1078_v58 }
 0x38b   : > { %1159 = vst.msk [vmem:[%s1546_s8 + $0x48] sm:$0xff] %vm1053_vm12, %v1143_v42  ;;  %1158 = vst.msk [vmem:[%s1546_s8 + $0x40] sm:$0xff] %vm1053_vm12, %v1142_v61 }
 0x38c   : > { %v1125_v0 = vpop.xlane.xlu1 %1124  ;;  %v1123_v1 = vpop.xlane.xlu0 %1122 }
 0x38d   : > { %v1145_v2 = vadd.f32 %v1125_v0, %v1081_v62  ;;  %v1144_v3 = vadd.f32 %v1123_v1, %v1080_v43 }
 0x38f   : > { %1161 = vst.msk [vmem:[%s1546_s8 + $0x58] sm:$0xff] %vm1053_vm12, %v1145_v2  ;;  %1160 = vst.msk [vmem:[%s1546_s8 + $0x50] sm:$0xff] %vm1053_vm12, %v1144_v3 }
 0x390   : > { %v1129_v5 = vpop.xlane.xlu1 %1128  ;;  %v1127_v6 = vpop.xlane.xlu0 %1126 }
 0x391   : > { %v1147_v7 = vadd.f32 %v1129_v5, %v1083_v31  ;;  %v1146_v8 = vadd.f32 %v1127_v6, %v1082_v4 }
 0x393   : > { %1163 = vst.msk [vmem:[%s1546_s8 + $0x68] sm:$0xff] %vm1053_vm12, %v1147_v7  ;;  %1162 = vst.msk [vmem:[%s1546_s8 + $0x60] sm:$0xff] %vm1053_vm12, %v1146_v8 }
 0x394   : > { %v1133_v10 = vpop.xlane.xlu1 %1132  ;;  %v1131_v11 = vpop.xlane.xlu0 %1130 }
 0x395   : > { %v1149_v63 = vadd.f32 %v1133_v10, %v1085_v35  ;;  %v1148_v12 = vadd.f32 %v1131_v11, %v1084_v9 }
 0x397   : > { %1165 = vst.msk [vmem:[%s1546_s8 + $0x78] sm:$0xff] %vm1053_vm12, %v1149_v63  ;;  %1164 = vst.msk [vmem:[%s1546_s8 + $0x70] sm:$0xff] %vm1053_vm12, %v1148_v12 }
 0x398 PF: > { %s16_s22 = sadd.s32 1, %s1467_s22   ;;  %s2102_s18 = smov %s1459_s20 }
 0x399   : > { %p13_p10 = scmp.ge.s32.totalorder %s16_s22, 8   ;;  %s2103_s19 = smov %s1463_s21 }
 0x39a   : > { %s2104_s20 = smov %s2107_s23  ;;  %s2105_s21 = smov %s2111_s24 }
 0x39b   :  { %15 = sbr.rel (!%p13_p10) target bundleno = 3 (0x3), region = 90 }

</bundles_post_ra>
